<compile_context>
chip_gen: v5e
topology: v5e:2x2
jax: 0.10.0
libtpu: 0.0.40
codegen_flags: <defaults>
</compile_context>

<pallas_src>
import functools

import jax
import jax.numpy as jnp
from jax.experimental import pallas as pl
from jax.experimental.pallas import tpu as pltpu


# ----------------------------------------------------------------------------
# Plain-JAX glue: SSD match() / encode() (standard utils.match semantics),
# vmapped over the batch with padded / masked ground-truth boxes.
# ----------------------------------------------------------------------------
def _point_form(boxes_cxcywh):
    return jnp.concatenate(
        [boxes_cxcywh[:, :2] - boxes_cxcywh[:, 2:] / 2.0,
         boxes_cxcywh[:, :2] + boxes_cxcywh[:, 2:] / 2.0], axis=1)


def _jaccard(box_a, box_b):
    # box_a: (A,4) xyxy, box_b: (B,4) xyxy
    max_xy = jnp.minimum(box_a[:, None, 2:], box_b[None, :, 2:])
    min_xy = jnp.maximum(box_a[:, None, :2], box_b[None, :, :2])
    wh = jnp.clip(max_xy - min_xy, 0.0, None)
    inter = wh[..., 0] * wh[..., 1]
    area_a = ((box_a[:, 2] - box_a[:, 0]) * (box_a[:, 3] - box_a[:, 1]))[:, None]
    area_b = ((box_b[:, 2] - box_b[:, 0]) * (box_b[:, 3] - box_b[:, 1]))[None, :]
    return inter / (area_a + area_b - inter)


def _encode(matched_xyxy, priors_cxcywh, variances):
    g_cxcy = (matched_xyxy[:, :2] + matched_xyxy[:, 2:]) / 2.0 - priors_cxcywh[:, :2]
    g_cxcy = g_cxcy / (variances[0] * priors_cxcywh[:, 2:])
    g_wh = (matched_xyxy[:, 2:] - matched_xyxy[:, :2]) / priors_cxcywh[:, 2:]
    g_wh = jnp.log(g_wh) / variances[1]
    return jnp.concatenate([g_cxcy, g_wh], axis=1)


def _match_one(threshold, priors_cxcywh, variances, truths, labels, valid):
    """truths: (N,4) xyxy (padded), labels: (N,) int32, valid: (N,) bool."""
    n_max = truths.shape[0]
    num_dbox = priors_cxcywh.shape[0]
    overlaps = _jaccard(truths, _point_form(priors_cxcywh))      # (N, D)
    overlaps = jnp.where(valid[:, None], overlaps, -1.0)         # padded rows never win
    best_prior_idx = jnp.argmax(overlaps, axis=1)                # (N,)
    best_truth_overlap = jnp.max(overlaps, axis=0)               # (D,)
    best_truth_idx = jnp.argmax(overlaps, axis=0)                # (D,)
    # each valid gt box keeps its best prior; invalid rows scatter OOB -> dropped
    scatter_idx = jnp.where(valid, best_prior_idx, num_dbox)
    best_truth_overlap = best_truth_overlap.at[scatter_idx].set(2.0, mode='drop')
    for j in range(n_max):   # static, small; later j wins on duplicates (matches reference)
        tgt = jnp.where(valid[j], best_prior_idx[j], num_dbox)
        best_truth_idx = best_truth_idx.at[tgt].set(j, mode='drop')
    matched = truths[best_truth_idx]                             # (D, 4)
    conf = labels[best_truth_idx] + 1                            # background = 0
    conf = jnp.where(best_truth_overlap < threshold, 0, conf)
    loc = _encode(matched, priors_cxcywh, variances)
    return loc.astype(jnp.float32), conf.astype(jnp.int32)


# ----------------------------------------------------------------------------
# Pallas kernel: per-image smooth-L1 + cross-entropy + hard negative mining.
# Each grid step (one image) writes its partial sums to its own output block;
# the batch reduction / normalization happens in the wrapper.
# ----------------------------------------------------------------------------
def _multibox_loss_kernel(loc_p_ref, loc_t_ref, conf_ref, label_ref,
                          out_ref, ce_col_ref,
                          *, negpos_ratio, num_dbox_real, chunk, n_chunks, unroll):
    loc_p = loc_p_ref[0]                       # (4, Dp) f32
    loc_t = loc_t_ref[0]                       # (4, Dp) f32
    conf = conf_ref[0]                         # (C, Dp) f32
    labels = label_ref[0]                      # (1, Dp) i32 (-1 => padded box)
    num_cls, num_dbox = conf.shape

    valid = labels >= 0                        # (1, Dp) bool
    pos = labels > 0                           # (1, Dp) bool
    pos_f = pos.astype(jnp.float32)

    # ---- localization: smooth L1 over positive boxes (reduction='sum') ----
    diff = loc_p - loc_t
    adiff = jnp.abs(diff)
    sl1 = jnp.where(adiff < 1.0, 0.5 * diff * diff, adiff - 0.5)          # (4, Dp)
    loss_l_i = jnp.sum(jnp.sum(sl1, axis=0, keepdims=True) * pos_f,
                       axis=1, keepdims=True)                              # (1, 1)

    # ---- per-box cross entropy: logsumexp(logits) - logits[target] (class on sublanes) ----
    cmax = jnp.max(conf, axis=0, keepdims=True)                            # (1, Dp)
    lse = jnp.log(jnp.sum(jnp.exp(conf - cmax), axis=0, keepdims=True)) + cmax
    cls_iota = jax.lax.broadcasted_iota(jnp.int32, (num_cls, num_dbox), 0)
    onehot = (cls_iota == labels).astype(jnp.float32)                      # (C, Dp)
    tgt_logit = jnp.sum(conf * onehot, axis=0, keepdims=True)
    ce = lse - tgt_logit                                                   # (1, Dp), >= 0

    # ---- hard negative mining: rank by descending loss (positives zeroed) ----
    # rank_i = #{j : l_j > l_i} + #{j : l_j == l_i and j < i}  (stable descending sort rank).
    # Positives get loss 0 (as in the reference); padded boxes get -1 so they rank last
    # and can never be selected (num_neg <= real D <= their rank).
    ce_hnm = jnp.where(pos, 0.0, ce)
    ce_hnm = jnp.where(valid, ce_hnm, -1.0)                                # (1, Dp)
    # One lane->sublane transpose per image (XLU); chunks are then cheap pl.ds row reads.
    ce_col_ref[...] = jnp.transpose(ce_hnm, (1, 0))                        # (Dp, 1)

    ii = jax.lax.broadcasted_iota(jnp.int32, (1, num_dbox), 1)             # (1, Dp)
    jrow = jax.lax.broadcasted_iota(jnp.int32, (chunk, 1), 0)              # (chunk, 1)

    def chunk_body(c, rank_acc):
        start = c * chunk
        lj = ce_col_ref[pl.ds(start, chunk), :]                            # (chunk, 1)
        jj = jrow + start                                                  # (chunk, 1)
        before = jnp.logical_or(lj > ce_hnm,
                                jnp.logical_and(lj == ce_hnm, jj < ii))    # (chunk, Dp)
        return rank_acc + jnp.sum(before.astype(jnp.int32), axis=0, keepdims=True)

    rank = jax.lax.fori_loop(0, n_chunks, chunk_body,
                             jnp.zeros((1, num_dbox), jnp.int32),
                             unroll=unroll)                                # (1, Dp)

    num_pos_i = jnp.sum(pos.astype(jnp.int32), axis=1, keepdims=True)      # (1, 1) i32
    num_neg = jnp.minimum(num_pos_i * negpos_ratio, num_dbox_real)         # clamp(max=num_dbox)
    neg = rank < num_neg                                                   # (1, Dp)

    # ---- confidence loss over (pos | neg), reduction='sum' ----
    sel_mask = jnp.logical_or(pos, neg).astype(jnp.float32)
    loss_c_i = jnp.sum(ce * sel_mask, axis=1, keepdims=True)               # (1, 1)

    # ---- pack (loss_l, loss_c, num_pos) into a lane-dense (8,128) output tile ----
    row = jax.lax.broadcasted_iota(jnp.int32, (8, 128), 0)
    npos_f = num_pos_i.astype(jnp.float32)
    packed = jnp.where(row == 0, loss_l_i,
             jnp.where(row == 1, loss_c_i,
             jnp.where(row == 2, npos_f, 0.0)))
    out_ref[0] = packed


def multibox_loss(loc_data, conf_data, dbox_list, targets,
                  jaccard_thresh=0.5, neg_pos=3):
    B, D, _ = loc_data.shape
    C = conf_data.shape[2]
    variances = (0.1, 0.2)

    # ---- vectorized matching (plain JAX, vmapped over the padded batch) ----
    n_max = max(int(t.shape[0]) for t in targets)
    truths_p, labels_p, valid_p = [], [], []
    for t in targets:
        n = int(t.shape[0])
        pad = n_max - n
        truths_p.append(jnp.pad(t[:, :4], ((0, pad), (0, 0))))
        labels_p.append(jnp.pad(t[:, 4].astype(jnp.int32), (0, pad)))
        valid_p.append(jnp.pad(jnp.ones((n,), jnp.bool_), (0, pad)))
    truths_b = jnp.stack(truths_p)                  # (B, n_max, 4)
    labels_b = jnp.stack(labels_p)                  # (B, n_max)
    valid_b = jnp.stack(valid_p)                    # (B, n_max)

    match_fn = functools.partial(_match_one, jaccard_thresh, dbox_list, variances)
    loc_t, conf_t = jax.vmap(match_fn)(truths_b, labels_b, valid_b)
    # loc_t: (B, D, 4) f32, conf_t: (B, D) i32

    # ---- lane-dense layouts; pad D up to a multiple of 128 (padded labels = -1) ----
    Dp = ((D + 127) // 128) * 128
    pad_d = Dp - D
    loc_p_t = jnp.transpose(loc_data, (0, 2, 1))    # (B, 4, D)
    loc_t_t = jnp.transpose(loc_t, (0, 2, 1))       # (B, 4, D)
    conf_t_t = jnp.transpose(conf_data, (0, 2, 1))  # (B, C, D)
    labels_t = conf_t.reshape(B, 1, D)              # (B, 1, D)
    if pad_d:
        loc_p_t = jnp.pad(loc_p_t, ((0, 0), (0, 0), (0, pad_d)))
        loc_t_t = jnp.pad(loc_t_t, ((0, 0), (0, 0), (0, pad_d)))
        conf_t_t = jnp.pad(conf_t_t, ((0, 0), (0, 0), (0, pad_d)))
        labels_t = jnp.pad(labels_t, ((0, 0), (0, 0), (0, pad_d)), constant_values=-1)

    chunk = 128
    n_chunks = Dp // chunk
    unroll = True if n_chunks <= 8 else 2

    kernel = functools.partial(_multibox_loss_kernel,
                               negpos_ratio=neg_pos, num_dbox_real=D,
                               chunk=chunk, n_chunks=n_chunks, unroll=unroll)

    parts = pl.pallas_call(
        kernel,
        out_shape=jax.ShapeDtypeStruct((B, 8, 128), jnp.float32),
        grid=(B,),
        in_specs=[
            pl.BlockSpec((1, 4, Dp), lambda b: (b, 0, 0)),
            pl.BlockSpec((1, 4, Dp), lambda b: (b, 0, 0)),
            pl.BlockSpec((1, C, Dp), lambda b: (b, 0, 0)),
            pl.BlockSpec((1, 1, Dp), lambda b: (b, 0, 0)),
        ],
        out_specs=pl.BlockSpec((1, 8, 128), lambda b: (b, 0, 0)),
        scratch_shapes=[pltpu.VMEM((Dp, 1), jnp.float32)],
        compiler_params=pltpu.CompilerParams(
            dimension_semantics=("parallel",),
            vmem_limit_bytes=48 * 1024 * 1024),
    )(loc_p_t, loc_t_t, conf_t_t, labels_t)

    loss_l_sum = jnp.sum(parts[:, 0, 0])
    loss_c_sum = jnp.sum(parts[:, 1, 0])
    n_pos = jnp.sum(parts[:, 2, 0])
    # PyTorch divides by N unguarded (NaN if no positives); guard with max(N, 1).
    inv_n = 1.0 / jnp.maximum(n_pos, 1.0)
    return loss_l_sum * inv_n, loss_c_sum * inv_n


# ----------------------------------------------------------------------------
# Deterministic example inputs
# ----------------------------------------------------------------------------
def make_dboxes(grid=16, scale=0.15):
    cs = (jnp.arange(grid, dtype=jnp.float32) + 0.5) / grid
    cx, cy = jnp.meshgrid(cs, cs, indexing="xy")
    w = jnp.full_like(cx, scale)
    return jnp.stack([cx.ravel(), cy.ravel(), w.ravel(), w.ravel()], axis=1)  # (grid*grid, 4)


if __name__ == "__main__":
    B, D, C = 2, 256, 8     # batch, num default boxes (16x16 grid), num classes (incl. background)
    key = jax.random.PRNGKey(0)
    k1, k2 = jax.random.split(key)
    loc_data = 0.1 * jax.random.normal(k1, (B, D, 4), jnp.float32)
    conf_data = jax.random.normal(k2, (B, D, C), jnp.float32)
    dbox_list = make_dboxes(16, 0.15)

    targets = [
        jnp.array([[0.10, 0.10, 0.40, 0.40, 2.0],
                   [0.50, 0.50, 0.90, 0.90, 1.0],
                   [0.20, 0.60, 0.55, 0.95, 4.0]], dtype=jnp.float32),
        jnp.array([[0.05, 0.20, 0.35, 0.60, 3.0],
                   [0.60, 0.10, 0.95, 0.45, 0.0]], dtype=jnp.float32),
    ]

    loss_l, loss_c = multibox_loss(loc_data, conf_data, dbox_list, targets,
                                   jaccard_thresh=0.5, neg_pos=3)
    jax.block_until_ready((loss_l, loss_c))
    print("KERNEL_OK")
</pallas_src>

<mosaic_0001>
module attributes {stable_mosaic.version = 11 : i64} {
  func.func @_multibox_loss_kernel(%arg0: i32, %arg1: memref<1x4x256xf32, #tpu.memory_space<vmem>>, %arg2: memref<1x4x256xf32, #tpu.memory_space<vmem>>, %arg3: memref<1x8x256xf32, #tpu.memory_space<vmem>>, %arg4: memref<1x1x256xi32, #tpu.memory_space<vmem>>, %arg5: memref<1x8x128xf32, #tpu.memory_space<vmem>>, %arg6: memref<256x1xf32, #tpu.memory_space<vmem>>) attributes {dimension_semantics = [#tpu.dimension_semantics<parallel>], iteration_bounds = array<i64: 2>, scalar_prefetch = 0 : i64, scratch_operands = 1 : i64, tpu.core_type = #tpu.core_type<tc>, window_params = [{transform_indices = @transform_0, window_bounds = array<i64: 1, 4, 256>}, {transform_indices = @transform_1, window_bounds = array<i64: 1, 4, 256>}, {transform_indices = @transform_2, window_bounds = array<i64: 1, 8, 256>}, {transform_indices = @transform_3, window_bounds = array<i64: 1, 1, 256>}, {transform_indices = @transform_4, window_bounds = array<i64: 1, 8, 128>}]} {
    %c0 = arith.constant 0 : index
    %c0_0 = arith.constant 0 : index
    %c0_1 = arith.constant 0 : index
    %0 = vector.load %arg1[%c0, %c0_0, %c0_1] : memref<1x4x256xf32, #tpu.memory_space<vmem>>, vector<1x4x256xf32>
    %1 = vector.shape_cast %0 : vector<1x4x256xf32> to vector<4x256xf32>
    %c0_2 = arith.constant 0 : index
    %c0_3 = arith.constant 0 : index
    %c0_4 = arith.constant 0 : index
    %2 = vector.load %arg2[%c0_2, %c0_3, %c0_4] : memref<1x4x256xf32, #tpu.memory_space<vmem>>, vector<1x4x256xf32>
    %3 = vector.shape_cast %2 : vector<1x4x256xf32> to vector<4x256xf32>
    %c0_5 = arith.constant 0 : index
    %c0_6 = arith.constant 0 : index
    %c0_7 = arith.constant 0 : index
    %4 = vector.load %arg3[%c0_5, %c0_6, %c0_7] : memref<1x8x256xf32, #tpu.memory_space<vmem>>, vector<1x8x256xf32>
    %5 = vector.shape_cast %4 : vector<1x8x256xf32> to vector<8x256xf32>
    %c0_8 = arith.constant 0 : index
    %c0_9 = arith.constant 0 : index
    %c0_10 = arith.constant 0 : index
    %6 = vector.load %arg4[%c0_8, %c0_9, %c0_10] : memref<1x1x256xi32, #tpu.memory_space<vmem>>, vector<1x1x256xi32>
    %7 = vector.shape_cast %6 : vector<1x1x256xi32> to vector<1x256xi32>
    %c0_i32 = arith.constant 0 : i32
    %8 = vector.broadcast %c0_i32 : i32 to vector<1x256xi32>
    %9 = arith.cmpi sge, %7, %8 : vector<1x256xi32>
    %c0_i32_11 = arith.constant 0 : i32
    %10 = vector.broadcast %c0_i32_11 : i32 to vector<1x256xi32>
    %11 = arith.cmpi sgt, %7, %10 : vector<1x256xi32>
    %12 = arith.extui %11 : vector<1x256xi1> to vector<1x256xi32>
    %13 = arith.sitofp %12 : vector<1x256xi32> to vector<1x256xf32>
    %14 = arith.subf %1, %3 : vector<4x256xf32>
    %15 = math.absf %14 : vector<4x256xf32>
    %cst = arith.constant 1.000000e+00 : f32
    %16 = vector.broadcast %cst : f32 to vector<4x256xf32>
    %17 = arith.cmpf olt, %15, %16 : vector<4x256xf32>
    %cst_12 = arith.constant 5.000000e-01 : f32
    %18 = vector.broadcast %cst_12 : f32 to vector<4x256xf32>
    %19 = arith.mulf %18, %14 : vector<4x256xf32>
    %20 = arith.mulf %19, %14 : vector<4x256xf32>
    %cst_13 = arith.constant 5.000000e-01 : f32
    %21 = vector.broadcast %cst_13 : f32 to vector<4x256xf32>
    %22 = arith.subf %15, %21 : vector<4x256xf32>
    %23 = arith.select %17, %20, %22 : vector<4x256xi1>, vector<4x256xf32>
    %cst_14 = arith.constant dense<0.000000e+00> : vector<256xf32>
    %24 = vector.multi_reduction <add>, %23, %cst_14 [0] : vector<4x256xf32> to vector<256xf32>
    %25 = vector.shape_cast %24 : vector<256xf32> to vector<1x256xf32>
    %26 = arith.mulf %25, %13 : vector<1x256xf32>
    %cst_15 = arith.constant dense<0.000000e+00> : vector<1xf32>
    %27 = vector.multi_reduction <add>, %26, %cst_15 [1] : vector<1x256xf32> to vector<1xf32>
    %28 = vector.shape_cast %27 : vector<1xf32> to vector<1x1xf32>
    %cst_16 = arith.constant dense<0xFF800000> : vector<256xf32>
    %29 = vector.multi_reduction <maximumf>, %5, %cst_16 [0] : vector<8x256xf32> to vector<256xf32>
    %30 = vector.shape_cast %29 : vector<256xf32> to vector<1x256xf32>
    %31 = vector.broadcast %30 : vector<1x256xf32> to vector<8x256xf32>
    %32 = arith.subf %5, %31 : vector<8x256xf32>
    %33 = math.exp %32 : vector<8x256xf32>
    %cst_17 = arith.constant dense<0.000000e+00> : vector<256xf32>
    %34 = vector.multi_reduction <add>, %33, %cst_17 [0] : vector<8x256xf32> to vector<256xf32>
    %35 = vector.shape_cast %34 : vector<256xf32> to vector<1x256xf32>
    %36 = math.log %35 : vector<1x256xf32>
    %37 = arith.addf %36, %30 : vector<1x256xf32>
    %38 = tpu.iota {dimensions = array<i32: 0>} : vector<8x256xi32>
    %39 = vector.broadcast %7 : vector<1x256xi32> to vector<8x256xi32>
    %40 = arith.cmpi eq, %38, %39 : vector<8x256xi32>
    %41 = arith.extui %40 : vector<8x256xi1> to vector<8x256xi32>
    %42 = arith.sitofp %41 : vector<8x256xi32> to vector<8x256xf32>
    %43 = arith.mulf %5, %42 : vector<8x256xf32>
    %cst_18 = arith.constant dense<0.000000e+00> : vector<256xf32>
    %44 = vector.multi_reduction <add>, %43, %cst_18 [0] : vector<8x256xf32> to vector<256xf32>
    %45 = vector.shape_cast %44 : vector<256xf32> to vector<1x256xf32>
    %46 = arith.subf %37, %45 : vector<1x256xf32>
    %cst_19 = arith.constant 0.000000e+00 : f32
    %47 = vector.broadcast %cst_19 : f32 to vector<1x256xf32>
    %48 = arith.select %11, %47, %46 : vector<1x256xi1>, vector<1x256xf32>
    %cst_20 = arith.constant -1.000000e+00 : f32
    %49 = vector.broadcast %cst_20 : f32 to vector<1x256xf32>
    %50 = arith.select %9, %48, %49 : vector<1x256xi1>, vector<1x256xf32>
    %51 = tpu.transpose %50, [1, 0] : vector<1x256xf32> -> vector<256x1xf32>
    %c0_21 = arith.constant 0 : index
    %c0_22 = arith.constant 0 : index
    %52 = vector.load %arg6[%c0_21, %c0_22] : memref<256x1xf32, #tpu.memory_space<vmem>>, vector<256x1xf32>
    tpu.vector_store %arg6[%c0_21, %c0_22], %51 {strides = array<i32>} : memref<256x1xf32, #tpu.memory_space<vmem>>, vector<256x1xf32>,
    %53 = tpu.iota {dimensions = array<i32: 1>} : vector<1x256xi32>
    %54 = tpu.iota {dimensions = array<i32: 0>} : vector<128x1xi32>
    %c0_i32_23 = arith.constant 0 : i32
    %55 = vector.broadcast %c0_i32_23 : i32 to vector<1x256xi32>
    %c0_i32_24 = arith.constant 0 : i32
    %c128_i32 = arith.constant 128 : i32
    %56 = arith.muli %c0_i32_24, %c128_i32 : i32
    %57 = arith.index_cast %56 : i32 to index
    %c0_25 = arith.constant 0 : index
    %58 = vector.load %arg6[%57, %c0_25] : memref<256x1xf32, #tpu.memory_space<vmem>>, vector<128x1xf32>
    %59 = vector.broadcast %56 : i32 to vector<128x1xi32>
    %60 = arith.addi %54, %59 : vector<128x1xi32>
    %61 = vector.broadcast %58 : vector<128x1xf32> to vector<128x256xf32>
    %62 = vector.broadcast %50 : vector<1x256xf32> to vector<128x256xf32>
    %63 = arith.cmpf ogt, %61, %62 : vector<128x256xf32>
    %64 = vector.broadcast %58 : vector<128x1xf32> to vector<128x256xf32>
    %65 = vector.broadcast %50 : vector<1x256xf32> to vector<128x256xf32>
    %66 = arith.cmpf oeq, %64, %65 : vector<128x256xf32>
    %67 = vector.broadcast %60 : vector<128x1xi32> to vector<128x256xi32>
    %68 = vector.broadcast %53 : vector<1x256xi32> to vector<128x256xi32>
    %69 = arith.cmpi slt, %67, %68 : vector<128x256xi32>
    %70 = arith.andi %66, %69 : vector<128x256xi1>
    %71 = arith.ori %63, %70 : vector<128x256xi1>
    %72 = arith.extui %71 : vector<128x256xi1> to vector<128x256xi32>
    %cst_26 = arith.constant dense<0> : vector<256xi32>
    %73 = vector.multi_reduction <add>, %72, %cst_26 [0] : vector<128x256xi32> to vector<256xi32>
    %74 = vector.shape_cast %73 : vector<256xi32> to vector<1x256xi32>
    %75 = arith.addi %55, %74 : vector<1x256xi32>
    %c1_i32 = arith.constant 1 : i32
    %c128_i32_27 = arith.constant 128 : i32
    %76 = arith.muli %c1_i32, %c128_i32_27 : i32
    %77 = arith.index_cast %76 : i32 to index
    %c0_28 = arith.constant 0 : index
    %78 = vector.load %arg6[%77, %c0_28] : memref<256x1xf32, #tpu.memory_space<vmem>>, vector<128x1xf32>
    %79 = vector.broadcast %76 : i32 to vector<128x1xi32>
    %80 = arith.addi %54, %79 : vector<128x1xi32>
    %81 = vector.broadcast %78 : vector<128x1xf32> to vector<128x256xf32>
    %82 = vector.broadcast %50 : vector<1x256xf32> to vector<128x256xf32>
    %83 = arith.cmpf ogt, %81, %82 : vector<128x256xf32>
    %84 = vector.broadcast %78 : vector<128x1xf32> to vector<128x256xf32>
    %85 = vector.broadcast %50 : vector<1x256xf32> to vector<128x256xf32>
    %86 = arith.cmpf oeq, %84, %85 : vector<128x256xf32>
    %87 = vector.broadcast %80 : vector<128x1xi32> to vector<128x256xi32>
    %88 = vector.broadcast %53 : vector<1x256xi32> to vector<128x256xi32>
    %89 = arith.cmpi slt, %87, %88 : vector<128x256xi32>
    %90 = arith.andi %86, %89 : vector<128x256xi1>
    %91 = arith.ori %83, %90 : vector<128x256xi1>
    %92 = arith.extui %91 : vector<128x256xi1> to vector<128x256xi32>
    %cst_29 = arith.constant dense<0> : vector<256xi32>
    %93 = vector.multi_reduction <add>, %92, %cst_29 [0] : vector<128x256xi32> to vector<256xi32>
    %94 = vector.shape_cast %93 : vector<256xi32> to vector<1x256xi32>
    %95 = arith.addi %75, %94 : vector<1x256xi32>
    %c2_i32 = arith.constant 2 : i32
    %96 = arith.extui %11 : vector<1x256xi1> to vector<1x256xi32>
    %cst_30 = arith.constant dense<0> : vector<1xi32>
    %97 = vector.multi_reduction <add>, %96, %cst_30 [1] : vector<1x256xi32> to vector<1xi32>
    %98 = vector.shape_cast %97 : vector<1xi32> to vector<1x1xi32>
    %c3_i32 = arith.constant 3 : i32
    %99 = vector.broadcast %c3_i32 : i32 to vector<1x1xi32>
    %100 = arith.muli %98, %99 : vector<1x1xi32>
    %c256_i32 = arith.constant 256 : i32
    %101 = vector.broadcast %c256_i32 : i32 to vector<1x1xi32>
    %102 = arith.minsi %100, %101 : vector<1x1xi32>
    %103 = vector.broadcast %102 : vector<1x1xi32> to vector<1x256xi32>
    %104 = arith.cmpi slt, %95, %103 : vector<1x256xi32>
    %105 = arith.ori %11, %104 : vector<1x256xi1>
    %106 = arith.extui %105 : vector<1x256xi1> to vector<1x256xi32>
    %107 = arith.sitofp %106 : vector<1x256xi32> to vector<1x256xf32>
    %108 = arith.mulf %46, %107 : vector<1x256xf32>
    %cst_31 = arith.constant dense<0.000000e+00> : vector<1xf32>
    %109 = vector.multi_reduction <add>, %108, %cst_31 [1] : vector<1x256xf32> to vector<1xf32>
    %110 = vector.shape_cast %109 : vector<1xf32> to vector<1x1xf32>
    %111 = tpu.iota {dimensions = array<i32: 0>} : vector<8x128xi32>
    %112 = arith.sitofp %98 : vector<1x1xi32> to vector<1x1xf32>
    %c0_i32_32 = arith.constant 0 : i32
    %113 = vector.broadcast %c0_i32_32 : i32 to vector<8x128xi32>
    %114 = arith.cmpi eq, %111, %113 : vector<8x128xi32>
    %c1_i32_33 = arith.constant 1 : i32
    %115 = vector.broadcast %c1_i32_33 : i32 to vector<8x128xi32>
    %116 = arith.cmpi eq, %111, %115 : vector<8x128xi32>
    %c2_i32_34 = arith.constant 2 : i32
    %117 = vector.broadcast %c2_i32_34 : i32 to vector<8x128xi32>
    %118 = arith.cmpi eq, %111, %117 : vector<8x128xi32>
    %cst_35 = arith.constant 0.000000e+00 : f32
    %119 = vector.shape_cast %112 : vector<1x1xf32> to vector<1x1xf32>
    %120 = vector.broadcast %119 : vector<1x1xf32> to vector<8x128xf32>
    %121 = vector.broadcast %cst_35 : f32 to vector<8x128xf32>
    %122 = arith.select %118, %120, %121 : vector<8x128xi1>, vector<8x128xf32>
    %123 = vector.shape_cast %110 : vector<1x1xf32> to vector<1x1xf32>
    %124 = vector.broadcast %123 : vector<1x1xf32> to vector<8x128xf32>
    %125 = arith.select %116, %124, %122 : vector<8x128xi1>, vector<8x128xf32>
    %126 = vector.shape_cast %28 : vector<1x1xf32> to vector<1x1xf32>
    %127 = vector.broadcast %126 : vector<1x1xf32> to vector<8x128xf32>
    %128 = arith.select %114, %127, %125 : vector<8x128xi1>, vector<8x128xf32>
    %c0_36 = arith.constant 0 : index
    %c0_37 = arith.constant 0 : index
    %c0_38 = arith.constant 0 : index
    %129 = vector.load %arg5[%c0_36, %c0_37, %c0_38] : memref<1x8x128xf32, #tpu.memory_space<vmem>>, vector<1x8x128xf32>
    %130 = vector.shape_cast %129 : vector<1x8x128xf32> to vector<8x128xf32>
    %131 = vector.shape_cast %128 : vector<8x128xf32> to vector<1x8x128xf32>
    tpu.vector_store %arg5[%c0_36, %c0_37, %c0_38], %131 {strides = array<i32>} : memref<1x8x128xf32, #tpu.memory_space<vmem>>, vector<1x8x128xf32>,
    return
  }
  func.func @transform_0(%arg0: i32) -> (i32, i32, i32) {
    %c0_i32 = arith.constant 0 : i32
    %c0_i32_0 = arith.constant 0 : i32
    %c0_i32_1 = arith.constant 0 : i32
    return %arg0, %c0_i32, %c0_i32_0 : i32, i32, i32
  }
  func.func @transform_1(%arg0: i32) -> (i32, i32, i32) {
    %c0_i32 = arith.constant 0 : i32
    %c0_i32_0 = arith.constant 0 : i32
    %c0_i32_1 = arith.constant 0 : i32
    return %arg0, %c0_i32, %c0_i32_0 : i32, i32, i32
  }
  func.func @transform_2(%arg0: i32) -> (i32, i32, i32) {
    %c0_i32 = arith.constant 0 : i32
    %c0_i32_0 = arith.constant 0 : i32
    %c0_i32_1 = arith.constant 0 : i32
    return %arg0, %c0_i32, %c0_i32_0 : i32, i32, i32
  }
  func.func @transform_3(%arg0: i32) -> (i32, i32, i32) {
    %c0_i32 = arith.constant 0 : i32
    %c0_i32_0 = arith.constant 0 : i32
    %c0_i32_1 = arith.constant 0 : i32
    return %arg0, %c0_i32, %c0_i32_0 : i32, i32, i32
  }
  func.func @transform_4(%arg0: i32) -> (i32, i32, i32) {
    %c0_i32 = arith.constant 0 : i32
    %c0_i32_0 = arith.constant 0 : i32
    %c0_i32_1 = arith.constant 0 : i32
    return %arg0, %c0_i32, %c0_i32_0 : i32, i32, i32
  }
}

</mosaic_0001>

<bundles_post_ra>
// kernel: tpu_custom_call.1
= control target key start
LH: loop header
LB: loop body
LE: loop exit
PB: predicated region body
PF: predicated region fallthrough
CT: control target
= control target key end

     0   :  { %s2534_s0 = inlined_call_operand.hbm [shape: f32[2,4,256], index: 0, kind: input, shape index: {}]   ;;  %s2535_s1 = inlined_call_operand.hbm [shape: f32[2,4,256], index: 1, kind: input, shape index: {}]   ;;  %s2536_s2 = inlined_call_operand.hbm [shape: f32[2,8,256], index: 2, kind: input, shape index: {}]   ;;  %s2537_s3 = inlined_call_operand.hbm [shape: s32[2,1,256], index: 3, kind: input, shape index: {}]   ;;  %s2538_s4 = inlined_call_operand.hbm [shape: f32[2,8,128], index: 4, kind: output, shape index: {}]  }
   0x1   :  { %2545 = sst [smem:[#allocation19_spill]] %s2535_s1 }
   0x2   :  { %9 = vsyncpa [#allocation4], 0 }
   0x3   :  { %11 = vsyncpa [#allocation4 + $0x1], 0 }
   0x4   :  { %12 = vsyncpa [#allocation7], 0 }
   0x5   :  { %14 = vsyncpa [#allocation7 + $0x1], 0 }
   0x6   :  { %15 = vsyncpa [#allocation10], 0 }
   0x7   :  { %17 = vsyncpa [#allocation10 + $0x1], 0 }
   0x8   :  { %18 = vsyncpa [#allocation5], 0 }
   0x9   :  { %20 = vsyncpa [#allocation5 + $0x1], 0  ;;  %s1783_s15 = smov 0   ;;  %s1785_s16 = smov 0  }
   0xa   :  { %s1787_s17 = smov 0   ;;  %s1789_s18 = smov 0  }
   0xb LB: > { %2546 = sst [smem:[#allocation16_spill]] %s1750_s17  ;;  %s1804_s19 = sadd.s32 4294967295, %s1754_s18   ;;  %s1754_s18 = sphi %s1789_s18, %s2597_s18   ;;  %s1750_s17 = sphi %s1787_s17, %s2599_s17   ;;  %s1746_s16 = sphi %s1785_s16, %s2601_s16   ;;  %s1742_s15 = sphi %s1783_s15, %s2600_s15  }
   0xc   : > { %s1454_s20 = sadd.s32 4294967294, %s1754_s18   ;;  %s1808_s21 = sadd.s32 1, %s1754_s18  }
   0xd   : > { %2547 = sst [smem:[#allocation17_spill]] %s1808_s21  ;;  %s33_s22 = sadd.s32 1, %s1750_s17 }
   0xe   : > { %s30_s23 = ssub.s32 %s1754_s18, %s1808_s21  ;;  %p40_p0 = scmp.ne.s32.totalorder %s1750_s17, %s1746_s16 }
   0xf   : > { %p31_p1 = scmp.eq.s32.totalorder %s30_s23, 0  ;;  %p41_p2 = scmp.eq.s32.totalorder %s1754_s18, 0 }
  0x10   : > { %p46_p3 = scmp.ne.s32.totalorder %s1746_s16, %s1742_s15  ;;  %p47_p4 = scmp.eq.s32.totalorder %s1804_s19, 0 }
  0x11   : > { %s1820_s24 = scalar_select %p31_p1, %s1750_s17, %s33_s22  }
  0x12   : > { %p42_p5 = por %p41_p2, %p40_p0  ;;  %p1822_p6 = por %p47_p4, %p46_p3 }
  0x13   : > { %2548 = sst [smem:[#allocation18_spill]] %s1820_s24  ;;  %p148_p7 = scmp.eq.s32.totalorder %s1804_s19, 1 }
  0x14   : > { %p154_p8 = scmp.eq.s32.totalorder %s1454_s20, 1  ;;  %p1456_p9 = scmp.ge.s32.totalorder %s1754_s18, 2 }
  0x15   : > { %p1513_p10 = scmp.lt.s32.totalorder %s1754_s18, 2  ;;  %p1829_p11 = por %p148_p7, %p40_p0 }
  0x16   : > { %p1833_p12 = por %p154_p8, %p46_p3  ;;  %s1838_s28 = sand.u32 1, %s1750_s17  }
  0x17   : > { %s1483_s29 = sshll.u32 %s1754_s18, 3  ;;  %s1457_s30 = sshll.u32 %s1838_s28, 3 }
  0x18   : > { %p1842_p13 = pnand %p1513_p10, %p42_p5  ;;  %s194_s6 = sand.u32 1, %s1754_s18  }
  0x19   : > { %s2553_s1 = sld [smem:[#allocation19_spill]]  ;;  %s198_s10 = scalar_lea.vmem [#allocation6], %s1457_s30 }
  0x1a   : > { %s207_s11 = sshll.u32 %s198_s10, 4  ;;  %p1468_p0 = scmp.ge.s32.totalorder %s1754_s18, 1  ;;  %s208_s11 = int_to_ptr.vmem [resolvable:$true] %s207_s11 }
  0x1b   : > { %s1853_s13 = scalar_lea.sflag [#allocation7], %s194_s6  ;;  %p1564_p2 = pneg %p1842_p13 }
  0x1f   : > { %s203_s9 = scalar_lea.hbm %s2553_s1, %s1483_s29  ;;  %s1567_s7 = scalar_lea.hbm %s2553_s1, 16 }
  0x20   : > { %s205_s12 = sshll.u32 %s203_s9, 4  ;;  %s206_s12 = int_to_ptr.hbm [resolvable:$true] %s205_s12 }
  0x21   : > { %s1560_s14 = sshra.s32 %s206_s12, 4  ;;  %s1561_s14 = int_to_ptr.hbm [resolvable:$true] %s1560_s14 }
  0x22   : > { %s1562_s20 = scalar_lea.hbm %s1561_s14, 8  ;;  %p1568_p5 = scmp.lt.s32.totalorder %s1561_s14, %s2553_s1 }
  0x23   : > { %p1563_p1 = scmp.ne.s32.totalorder %s1561_s14, %s1562_s20  ;;  %p1569_p7 = scmp.lt.s32.totalorder %s1567_s7, %s1562_s20 }
  0x25   : > { %p1565_p3 = pnand %p1564_p2, %p1563_p1  ;;  %p1570_p8 = por %p1569_p7, %p1568_p5 }
  0x27   : > { %p1566_p4 = pneg %p1565_p3 }
  0x29   : > { %p1571_p10 = pnand %p1570_p8, %p1566_p4 }
  0x2b   : > { %1574 = shalt.err (!%p1571_p10)
}
  0x2c   : > { %1502 = dma.hbm_to_vmem [thread:$0]  (!%p1842_p13), %s206_s12, 128, %s208_s11, %s1853_s13  }
  0x2d   : > { %p251_p1 = scmp.lt.s32.totalorder %s1754_s18, 3  ;;  %s183_s22 = scalar_lea.hbm %s2534_s0, %s1483_s29 }
  0x2e   : > { %s185_s20 = sshll.u32 %s183_s22, 4  ;;  %s178_s23 = scalar_lea.vmem [#allocation3], %s1457_s30  ;;  %s186_s20 = int_to_ptr.hbm [resolvable:$true] %s185_s20 }
  0x2f   : > { %p1875_p3 = pnand %p1468_p0, %p251_p1  ;;  %s187_s7 = sshll.u32 %s178_s23, 4  ;;  %s188_s7 = int_to_ptr.vmem [resolvable:$true] %s187_s7 }
  0x30   : > { %s1463_s8 = sshll.u32 %s1838_s28, 4  ;;  %s175_s9 = scalar_lea.sflag [#allocation4], %s1838_s28 }
  0x31   : > { %s1590_s1 = sshra.s32 %s186_s20, 4  ;;  %s1597_s6 = scalar_lea.hbm %s2534_s0, 16  ;;  %s1591_s1 = int_to_ptr.hbm [resolvable:$true] %s1590_s1 }
  0x32   : > { %s1592_s11 = scalar_lea.hbm %s1591_s1, 8  ;;  %p1598_p0 = scmp.lt.s32.totalorder %s1591_s1, %s2534_s0 }
  0x33   : > { %p1593_p4 = scmp.ne.s32.totalorder %s1591_s1, %s1592_s11  ;;  %p1599_p8 = scmp.lt.s32.totalorder %s1597_s6, %s1592_s11 }
  0x35   : > { %p1595_p5 = pnand %p1593_p4, %p1564_p2  ;;  %p1600_p10 = por %p1599_p8, %p1598_p0 }
  0x37   : > { %p1596_p7 = pneg %p1595_p5 }
  0x39   : > { %p1601_p1 = pnand %p1600_p10, %p1596_p7 }
  0x3b   : > { %1604 = shalt.err (!%p1601_p1)
}
  0x3c   : > { %1499 = dma.hbm_to_vmem [thread:$0]  (!%p1842_p13), %s186_s20, 128, %s188_s7, %s175_s9  }
  0x3d   : > { %s1485_s30 = sshll.u32 %s1754_s18, 4  ;;  %s218_s29 = scalar_lea.vmem [#allocation8], %s1463_s8 }
  0x3e   : > { %s223_s17 = scalar_lea.hbm %s2536_s2, %s1485_s30  ;;  %s227_s12 = sshll.u32 %s218_s29, 4  ;;  %s228_s12 = int_to_ptr.vmem [resolvable:$true] %s227_s12 }
  0x3f   : > { %s225_s21 = sshll.u32 %s223_s17, 4  ;;  %s1627_s7 = scalar_lea.hbm %s2536_s2, 32  ;;  %s226_s21 = int_to_ptr.hbm [resolvable:$true] %s225_s21 }
  0x40   : > { %s1620_s1 = sshra.s32 %s226_s21, 4  ;;  %s1621_s1 = int_to_ptr.hbm [resolvable:$true] %s1620_s1 }
  0x41   : > { %s1622_s11 = scalar_lea.hbm %s1621_s1, 16  ;;  %p1628_p0 = scmp.lt.s32.totalorder %s1621_s1, %s2536_s2 }
  0x42   : > { %p1623_p4 = scmp.ne.s32.totalorder %s1621_s1, %s1622_s11  ;;  %p1629_p8 = scmp.lt.s32.totalorder %s1627_s7, %s1622_s11 }
  0x44   : > { %p1625_p5 = pnand %p1623_p4, %p1564_p2  ;;  %p1630_p10 = por %p1629_p8, %p1628_p0 }
  0x46   : > { %p1626_p7 = pneg %p1625_p5 }
  0x48   : > { %p1631_p1 = pnand %p1630_p10, %p1626_p7 }
  0x4a   : > { %1634 = shalt.err (!%p1631_p1)
}
  0x4b   : > { %1505 = dma.hbm_to_vmem [thread:$0]  (!%p1842_p13), %s226_s21, 256, %s228_s12, %s1853_s13  }
  0x4c   : > { %s1466_s17 = sshll.u32 %s1838_s28, 1  ;;  %s1467_s8 = sshll.u32 %s1754_s18, 1 }
  0x4d   : > { %s242_s30 = scalar_lea.hbm %s2537_s3, %s1467_s8  ;;  %s238_s29 = scalar_lea.vmem [#allocation9], %s1466_s17 }
  0x4e   : > { %s244_s23 = sshll.u32 %s242_s30, 4  ;;  %s246_s1 = sshll.u32 %s238_s29, 4  ;;  %s245_s23 = int_to_ptr.hbm [resolvable:$true] %s244_s23  ;;  %s247_s1 = int_to_ptr.vmem [resolvable:$true] %s246_s1 }
  0x4f   : > { %s235_s11 = scalar_lea.sflag [#allocation10], %s1838_s28  ;;  %s1650_s6 = sshra.s32 %s245_s23, 4  ;;  %s1651_s6 = int_to_ptr.hbm [resolvable:$true] %s1650_s6 }
  0x50   : > { %s1652_s20 = scalar_lea.hbm %s1651_s6, 2  ;;  %s1657_s12 = scalar_lea.hbm %s2537_s3, 4 }
  0x51   : > { %p1653_p4 = scmp.ne.s32.totalorder %s1651_s6, %s1652_s20  ;;  %p1658_p0 = scmp.lt.s32.totalorder %s1651_s6, %s2537_s3 }
  0x52   : > { %p1659_p8 = scmp.lt.s32.totalorder %s1657_s12, %s1652_s20 }
  0x53   : > { %p1655_p5 = pnand %p1653_p4, %p1564_p2 }
  0x54   : > { %p1660_p10 = por %p1659_p8, %p1658_p0 }
  0x55   : > { %p1656_p7 = pneg %p1655_p5 }
  0x57   : > { %p1661_p1 = pnand %p1660_p10, %p1656_p7 }
  0x59   : > { %1664 = shalt.err (!%p1661_p1)
}
  0x5a   : > { %1508 = dma.hbm_to_vmem [thread:$0]  (!%p1842_p13), %s245_s23, 32, %s247_s1, %s235_s11  }
  0x5b   : > { %255 = sbr.rel (%p1875_p3) target bundleno = 887 (0x377), region = 36  ;;  %s1930_s28 = sand.u32 (!%p1875_p3), 1, %s1746_s16  }
  0x5c   : > { %s1933_s24 = sshll.u32 (!%p1875_p3), %s1930_s28, 3  ;;  %s258_s17 = scalar_lea.sflag (!%p1875_p3), [#allocation4], %s1930_s28 }
  0x5d   : > { %s261_s8 = scalar_lea.vmem (!%p1875_p3), [#allocation3], %s1933_s24 }
  0x60   : > { %1725 = dma.done.wait (%p1822_p6), %s258_s17, 128  }
  0x61   : > { %1727 = vsyncadd (%p1822_p6), %s258_s17, 4294967168  ;;  %s267_s5 = sand.u32 1, %s1804_s19   ;;  %s271_s10 = scalar_lea.vmem [#allocation6], %s1933_s24 }
  0x62   : > { %s268_s14 = scalar_lea.sflag [#allocation7], %s267_s5 }
  0x63   : > { %1729 = dma.done.wait (%p1822_p6), %s268_s14, 384  }
  0x64   : > { %1731 = vsyncadd (%p1822_p6), %s268_s14, 4294966912  ;;  %s1471_s22 = sshll.u32 %s1930_s28, 4  ;;  %s1472_s30 = sshll.u32 %s1930_s28, 1 }
  0x65   : > { %s281_s23 = scalar_lea.vmem [#allocation8], %s1471_s22  ;;  %s288_s29 = scalar_lea.sflag [#allocation10], %s1930_s28 }
  0x66   : > { %s291_s1 = scalar_lea.vmem [#allocation9], %s1472_s30 }
  0x67   : > { %1733 = dma.done.wait (%p1822_p6), %s288_s29, 32  }
  0x68   : > { %1735 = vsyncadd (%p1822_p6), %s288_s29, 4294967264  ;;  %v332_v0 = vld [vmem:[%s261_s8] sm:$0xff]  ;;  %v333_v1 = vld [vmem:[%s271_s10] sm:$0xff]  ;;  %v418_v17 = vlaneseq  ;;  %vm354_vm1 = vcmask 1043456   ;;  %v1756_v37 = vmov 0.0   ;;  %vm2542_vm5 = vcmask 1040384  }
  0x69   : > { %v334_v2 = vld [vmem:[%s281_s23] sm:$0xff]  ;;  %v335_v3 = vld [vmem:[%s281_s23 + $0x8] sm:$0xff]  ;;  %v341_v4 = vsub.f32 %v332_v0, %v333_v1  ;;  %vm2544_vm7 = vcmask 7168   ;;  %s1480_s25 = sshll.u32 %s1804_s19, 3  ;;  %s331_s21 = scalar_lea.vmem [#allocation11], %s1933_s24 }
  0x6a   : > { %v382_v5 = vrot.slane %v334_v2, 4  ;;  %v388_v6 = vrot.slane %v335_v3, 4  ;;  %v1954_v19 = vld [vmem:[%s291_s1] sm:$0x3]  ;;  %v1960_v24 = vshrl.u32 %v418_v17, 7  ;;  %s1313_s20 = scalar_lea.hbm %s2538_s4, %s1480_s25  ;;  %s1315_s13 = sshll.u32 %s331_s21, 4  ;;  %s1316_s13 = int_to_ptr.vmem [resolvable:$true] %s1315_s13 }
  0x6b   : > { %v342_v7 = vand.u32 2147483647, %v341_v4  ;;  %v344_v8 = vmul.f32 0.5, %v341_v4  ;;  %v420_v22 = vperm.slane %v1954_v19, 0  ;;  %v421_v25 = vperm.slane %v1954_v19, 1  ;;  %s1317_s12 = sshll.u32 %s1313_s20, 4  ;;  %s1318_s12 = int_to_ptr.hbm [resolvable:$true] %s1317_s12 }
  0x6c   : > { %v383_v9 = vmax.f32 %v334_v2, %v382_v5  ;;  %v389_v10 = vmax.f32 %v335_v3, %v388_v6  ;;  %vm2543_vm4 = vcmp.gt.s32.totalorder %v1954_v19, 0  ;;  %vm337_vm6 = vcmp.ge.s32.totalorder %v1954_v19, 0  ;;  %s1303_s19 = scalar_lea.sflag [#allocation5], %s1930_s28  ;;  %s1694_s7 = sshra.s32 %s1318_s12, 4  ;;  %s1695_s7 = int_to_ptr.hbm [resolvable:$true] %s1694_s7 }
  0x6d   : > { %vm343_vm0 = vcmp.lt.f32.partialorder %v342_v7, 1.0  ;;  %v345_v11 = vmul.f32 %v344_v8, %v341_v4  ;;  %v1475_v12 = vadd.f32 -0.5, %v342_v7  ;;  %vm422_vm2 = vcmp.eq.s32.totalorder %v1960_v24, %v420_v22  ;;  %s1696_s9 = scalar_lea.hbm %s1695_s7, 8  ;;  %s1700_s8 = scalar_lea.hbm %s2538_s4, 16 }
  0x6e   : > { %v384_v13 = vrot.slane %v383_v9, 2  ;;  %v390_v14 = vrot.slane %v389_v10, 2  ;;  %vm423_vm3 = vcmp.eq.s32.totalorder %v1960_v24, %v421_v25  ;;  %v1476_v38 = vsel %vm422_vm2, 1.0, %v1756_v37  ;;  %p1697_p6 = scmp.ne.s32.totalorder %s1695_s7, %s1696_s9  ;;  %p1701_p3 = scmp.lt.s32.totalorder %s1695_s7, %s2538_s4 }
  0x6f   : > { %v347_v15 = vsel %vm343_vm0, %v345_v11, %v1475_v12  ;;  %v1477_v39 = vsel %vm423_vm3, 1.0, %v1756_v37  ;;  %v428_v42 = vmul.f32 %v1476_v38, %v334_v2  ;;  %v1474_v43 = vsel %vm2543_vm4, 1.0, %v1756_v37  ;;  %p1702_p4 = scmp.lt.s32.totalorder %s1700_s8, %s1696_s9 }
  0x70   : > { %v385_v16 = vmax.f32 %v383_v9, %v384_v13  ;;  %349 = vst [vmem:[#allocation1] ss:$2 sm:$0xff] %v347_v15  ;;  %v391_v18 = vmax.f32 %v389_v10, %v390_v14  ;;  %v429_v46 = vmul.f32 %v1477_v39, %v335_v3  ;;  %v370_v50 = vperm.slane %v1474_v43, 0  ;;  %p1698_p13 = pnand %p1697_p6, %p1829_p11 }
  0x71   : > { %v371_v51 = vperm.slane %v1474_v43, 1  ;;  %v430_v52 = vrot.slane %v428_v42, 4  ;;  %p1703_p5 = por %p1702_p4, %p1701_p3 }
  0x72   : > { %v386_v20 = vrot.slane %v385_v16, 1  ;;  %v392_v21 = vrot.slane %v391_v18, 1  ;;  %v436_v57 = vrot.slane %v429_v46, 4  ;;  %p1699_p2 = pneg %p1698_p13 }
  0x73   : > { %v431_v63 = vadd.f32 %v430_v52, %v428_v42 }
  0x74   : > { %v1957_v23 = vmax.f32 %v385_v16, %v386_v20  ;;  %v1963_v26 = vmax.f32 %v391_v18, %v392_v21  ;;  %p1704_p7 = pnand %p1703_p5, %p1699_p2 }
  0x75   : > { %v432_v11 = vrot.slane %v431_v63, 2 }
  0x76   : > { %v394_v27 = vsub.f32 %v334_v2, %v1957_v23  ;;  %v395_v28 = vsub.f32 %v335_v3, %v1963_v26  ;;  %v437_v3 = vadd.f32 %v436_v57, %v429_v46 }
  0x77   : > { %v350_v29 = vld.sshfl [vmem:[#allocation1] sm:$0xff pattern:$0x75316420]  ;;  %v351_v30 = vld.sshfl [vmem:[#allocation1 + $0x8] sm:$0xff pattern:$0x75316420]  ;;  %v433_v16 = vadd.f32 %v432_v11, %v431_v63 }
  0x78   : > { %v355_v31 = vsel %vm354_vm1, %v350_v29, 0.0  ;;  %v362_v32 = vsel %vm354_vm1, %v351_v30, 0.0  ;;  %v396_v33 = vmul.f32 1.442695, %v394_v27  ;;  %v398_v34 = vmul.f32 1.442695, %v395_v28 }
  0x79   : > { %v356_v35 = vrot.slane %v355_v31, 4  ;;  %v363_v36 = vrot.slane %v362_v32, 4  ;;  %v438_v12 = vrot.slane %v437_v3, 2  ;;  %v434_v20 = vrot.slane %v433_v16, 1 }
  0x7a   : > { %1552 = vpow2.f32 %v396_v33 }
  0x7b   : > { %v357_v40 = vadd.f32 %v356_v35, %v355_v31  ;;  %v364_v41 = vadd.f32 %v363_v36, %v362_v32  ;;  %1554 = vpow2.f32 %v398_v34  ;;  %v439_v18 = vadd.f32 %v438_v12, %v437_v3 }
  0x7c   : > { %v435_v29 = vadd.f32 %v434_v20, %v433_v16 }
  0x7d   : > { %v358_v44 = vrot.slane %v357_v40, 2  ;;  %v365_v45 = vrot.slane %v364_v41, 2  ;;  %v440_v21 = vrot.slane %v439_v18, 1 }
  0x7f   : > { %v359_v47 = vadd.f32 %v358_v44, %v357_v40  ;;  %v366_v48 = vadd.f32 %v365_v45, %v364_v41  ;;  %v441_v30 = vadd.f32 %v440_v21, %v439_v18 }
  0x80   : > { %v1553_v49 = vpop.eup %1552 }
  0x81   : > { %v1555_v53 = vpop.eup %1554  ;;  %v360_v54 = vrot.slane %v359_v47, 1  ;;  %v367_v55 = vrot.slane %v366_v48, 1  ;;  %v400_v56 = vrot.slane %v1553_v49, 4 }
  0x82   : > { %v406_v58 = vrot.slane %v1555_v53, 4 }
  0x83   : > { %v361_v59 = vadd.f32 %v360_v54, %v359_v47  ;;  %v368_v60 = vadd.f32 %v367_v55, %v366_v48  ;;  %v401_v61 = vadd.f32 %v1553_v49, %v400_v56 }
  0x84   : > { %v407_v62 = vadd.f32 %v1555_v53, %v406_v58 }
  0x85   : > { %v374_v0 = vmul.f32 %v370_v50, %v361_v59  ;;  %v375_v1 = vmul.f32 %v371_v51, %v368_v60  ;;  %v402_v2 = vrot.slane %v401_v61, 2 }
  0x86   : > { %v408_v4 = vrot.slane %v407_v62, 2 }
  0x87   : > { %v377_v5 = vsel %vm2542_vm5, %v374_v0, 0.0  ;;  %v378_v6 = vsel %vm2542_vm5, %v375_v1, 0.0  ;;  %v403_v7 = vadd.f32 %v402_v2, %v401_v61 }
  0x88   : > { %v379_v8 = vadd.f32 %v378_v6, %v377_v5  ;;  %v409_v9 = vadd.f32 %v408_v4, %v407_v62 }
  0x89   : > { %v404_v10 = vrot.slane %v403_v7, 1 }
  0x8a   : > { %v410_v13 = vrot.slane %v409_v9, 1  ;;  %380 = vadd.xlane.f32.xlu0 %v379_v8 }
  0x8b   : > { %v405_v14 = vadd.f32 %v404_v10, %v403_v7 }
  0x8c   : > { %v411_v15 = vadd.f32 %v410_v13, %v409_v9 }
  0x8d   : > { %1556 = vlog2.f32 %v405_v14 }
  0x8e   : > { %1558 = vlog2.f32 %v411_v15 }
  0x93   : > { %v1557_v22 = vpop.eup %1556 }
  0x94   : > { %v1559_v25 = vpop.eup %1558  ;;  %v413_v27 = vmul.f32 0.6931472, %v1557_v22 }
  0x95   : > { %v415_v28 = vmul.f32 0.6931472, %v1559_v25 }
  0x96   : > { %v416_v31 = vadd.f32 %v413_v27, %v1957_v23  ;;  %v2029_v27 = vand.u32 127, %v418_v17 }
  0x97   : > { %v417_v32 = vadd.f32 %v415_v28, %v1963_v26  ;;  %v1757_v26 = vmov 0   ;;  %v2032_v28 = vadd.s32 8, %v1960_v24 }
  0x98   : > { %v1979_v33 = vsub.f32 %v416_v31, %v435_v29  ;;  %1550 = vset.pattern.permute.xlu2 %v1757_v26  ;;  %v2038_v31 = vadd.s32 24, %v1960_v24 }
  0x99   : > { %v1981_v34 = vsub.f32 %v417_v32, %v441_v30  ;;  %vm733_vm8 = vcmp.lt.s32.totalorder %v2032_v28, %v2029_v27 }
  0x9a   : > { %vm737_vm14 = vcmp.lt.s32.totalorder %v2038_v31, %v2029_v27 }
  0x9b   : > { %v446_v35 = vrot.slane %v1981_v34, 7 }
  0x9d   : > { %v447_v36 = vsel %vm2542_vm5, %v1979_v33, %v446_v35 }
  0x9e   : > { %v449_v38 = vsel %vm2543_vm4, 0.0, %v447_v36 }
  0x9f   : > { %v450_v39 = vsel %vm337_vm6, %v449_v38, -1.0 }
  0xa0   : > { %v1989_v40 = vperm.slane %v450_v39, 1  ;;  %v1992_v23 = vperm.slane %v450_v39, 0 }
  0xa2   : > { %488 = vxpose.xlu1.b32.start.end [1/1] (short) %v1989_v40, 128 }
  0xb3   : > { %456 = vxpose.xlu0.b32.start.end [1/1] (short) %v1992_v23, 128 }
  0xf5   : > { %1549 = vset.pattern.permute.xlu1 %v1757_v26 }
  0xfd   : > { %v1999_v43 = vpop.xlane.xlu0 %380 }
 0x11a   : > { %1551 = vset.pattern.permute.xlu0 %v1757_v26 }
 0x146   : > { %v504_v41 = vpop.trf.xlu1 }
 0x147   : > { %537 = vst.msk [vmem:[#allocation2 + $0x80] sm:$0xff] %vm2544_vm7, %v504_v41 }
 0x14e   : > { %v505_v42 = vpop.trf.xlu1  ;;  %v901_v6 = vld [vmem:[#allocation2 + $0x80] sm:$0xff] }
 0x14f   : > { %538 = vst.msk [vmem:[#allocation2 + $0x88] sm:$0xff] %vm2544_vm7, %v505_v42  ;;  %v2055_v42 = vadd.s32 16, %v1960_v24 }
 0x156   : > { %v506_v44 = vpop.trf.xlu1  ;;  %v902_v9 = vld [vmem:[#allocation2 + $0x88] sm:$0xff] }
 0x157   : > { %v472_v45 = vpop.trf.xlu0  ;;  %539 = vst.msk [vmem:[#allocation2 + $0x90] sm:$0xff] %vm2544_vm7, %v506_v44 }
 0x158   : > { %521 = vst.msk [vmem:[#allocation2] sm:$0xff] %vm2544_vm7, %v472_v45 }
 0x15e   : > { %v507_v46 = vpop.trf.xlu1  ;;  %v903_v11 = vld [vmem:[#allocation2 + $0x90] sm:$0xff] }
 0x15f   : > { %v473_v47 = vpop.trf.xlu0  ;;  %540 = vst.msk [vmem:[#allocation2 + $0x98] sm:$0xff] %vm2544_vm7, %v507_v46  ;;  %v571_v54 = vld [vmem:[#allocation2] sm:$0xff] }
 0x160   : > { %522 = vst.msk [vmem:[#allocation2 + $0x8] sm:$0xff] %vm2544_vm7, %v473_v47 }
 0x166   : > { %v508_v48 = vpop.trf.xlu1  ;;  %v904_v14 = vld [vmem:[#allocation2 + $0x98] sm:$0xff] }
 0x167   : > { %v474_v49 = vpop.trf.xlu0  ;;  %v572_v50 = vld [vmem:[#allocation2 + $0x8] sm:$0xff]  ;;  %541 = vst.msk [vmem:[#allocation2 + $0xa0] sm:$0xff] %vm2544_vm7, %v508_v48  ;;  %v2062_v48 = vadd.s32 32, %v1960_v24 }
 0x168   : > { %523 = vst.msk [vmem:[#allocation2 + $0x10] sm:$0xff] %vm2544_vm7, %v474_v49  ;;  %594 = vperm.xlu2 %1550, %v572_v50   ;;  %v2065_v50 = vadd.s32 40, %v1960_v24 }
 0x16e   : > { %v509_v51 = vpop.trf.xlu1  ;;  %v905_v18 = vld [vmem:[#allocation2 + $0xa0] sm:$0xff] }
 0x16f   : > { %v475_v52 = vpop.trf.xlu0  ;;  %v573_v53 = vld [vmem:[#allocation2 + $0x10] sm:$0xff]  ;;  %542 = vst.msk [vmem:[#allocation2 + $0xa8] sm:$0xff] %vm2544_vm7, %v509_v51 }
 0x170   : > { %524 = vst.msk [vmem:[#allocation2 + $0x18] sm:$0xff] %vm2544_vm7, %v475_v52  ;;  %599 = vperm.xlu2 %1550, %v573_v53   ;;  %v920_v52 = vadd.s32 128, %v2038_v31 }
 0x174   : > { %589 = vperm.xlu1 %1549, %v571_v54  }
 0x176   : > { %v510_v55 = vpop.trf.xlu1  ;;  %v906_v25 = vld [vmem:[#allocation2 + $0xa8] sm:$0xff] }
 0x177   : > { %v476_v56 = vpop.trf.xlu0  ;;  %v574_v57 = vld [vmem:[#allocation2 + $0x18] sm:$0xff]  ;;  %543 = vst.msk [vmem:[#allocation2 + $0xb0] sm:$0xff] %vm2544_vm7, %v510_v55 }
 0x178   : > { %525 = vst.msk [vmem:[#allocation2 + $0x20] sm:$0xff] %vm2544_vm7, %v476_v56  ;;  %604 = vperm.xlu2 %1550, %v574_v57   ;;  %v2096_v57 = vadd.s32 48, %v1960_v24 }
 0x17e   : > { %v511_v58 = vpop.trf.xlu1  ;;  %v907_v30 = vld [vmem:[#allocation2 + $0xb0] sm:$0xff] }
 0x17f   : > { %v477_v59 = vpop.trf.xlu0  ;;  %v575_v60 = vld [vmem:[#allocation2 + $0x20] sm:$0xff]  ;;  %544 = vst.msk [vmem:[#allocation2 + $0xb8] sm:$0xff] %vm2544_vm7, %v511_v58 }
 0x180   : > { %526 = vst.msk [vmem:[#allocation2 + $0x28] sm:$0xff] %vm2544_vm7, %v477_v59  ;;  %609 = vperm.xlu2 %1550, %v575_v60  }
 0x186   : > { %v512_v61 = vpop.trf.xlu1  ;;  %v908_v35 = vld [vmem:[#allocation2 + $0xb8] sm:$0xff] }
 0x187   : > { %v478_v62 = vpop.trf.xlu0  ;;  %v576_v63 = vld [vmem:[#allocation2 + $0x28] sm:$0xff]  ;;  %545 = vst.msk [vmem:[#allocation2 + $0xc0] sm:$0xff] %vm2544_vm7, %v512_v61  ;;  %v921_v61 = vadd.s32 128, %v2062_v48 }
 0x188   : > { %527 = vst.msk [vmem:[#allocation2 + $0x30] sm:$0xff] %vm2544_vm7, %v478_v62  ;;  %614 = vperm.xlu2 %1550, %v576_v63  }
 0x18e   : > { %v513_v0 = vpop.trf.xlu1  ;;  %v909_v49 = vld [vmem:[#allocation2 + $0xc0] sm:$0xff] }
 0x18f   : > { %v479_v1 = vpop.trf.xlu0  ;;  %v577_v2 = vld [vmem:[#allocation2 + $0x30] sm:$0xff]  ;;  %546 = vst.msk [vmem:[#allocation2 + $0xc8] sm:$0xff] %vm2544_vm7, %v513_v0 }
 0x190   : > { %528 = vst.msk [vmem:[#allocation2 + $0x38] sm:$0xff] %vm2544_vm7, %v479_v1  ;;  %619 = vperm.xlu2 %1550, %v577_v2  }
 0x196   : > { %v514_v3 = vpop.trf.xlu1 }
 0x197   : > { %v480_v4 = vpop.trf.xlu0  ;;  %v578_v5 = vld [vmem:[#allocation2 + $0x38] sm:$0xff]  ;;  %547 = vst.msk [vmem:[#allocation2 + $0xd0] sm:$0xff] %vm2544_vm7, %v514_v3 }
 0x198   : > { %529 = vst.msk [vmem:[#allocation2 + $0x40] sm:$0xff] %vm2544_vm7, %v480_v4  ;;  %624 = vperm.xlu2 %1550, %v578_v5  }
 0x19e   : > { %v515_v7 = vpop.trf.xlu1 }
 0x19f   : > { %v579_v8 = vld [vmem:[#allocation2 + $0x40] sm:$0xff]  ;;  %548 = vst.msk [vmem:[#allocation2 + $0xd8] sm:$0xff] %vm2544_vm7, %v515_v7  ;;  %v481_v13 = vpop.trf.xlu0 }
 0x1a0   : > { %935 = vperm.xlu2 %1550, %v901_v6   ;;  %629 = vperm.xlu0 %1551, %v579_v8   ;;  %530 = vst.msk [vmem:[#allocation2 + $0x48] sm:$0xff] %vm2544_vm7, %v481_v13 }
 0x1a6   : > { %v516_v10 = vpop.trf.xlu1 }
 0x1a7   : > { %549 = vst.msk [vmem:[#allocation2 + $0xe0] sm:$0xff] %vm2544_vm7, %v516_v10  ;;  %v482_v16 = vpop.trf.xlu0  ;;  %v580_v56 = vld [vmem:[#allocation2 + $0x48] sm:$0xff] }
 0x1a8   : > { %940 = vperm.xlu2 %1550, %v902_v9   ;;  %531 = vst.msk [vmem:[#allocation2 + $0x50] sm:$0xff] %vm2544_vm7, %v482_v16  ;;  %v910_v10 = vld [vmem:[#allocation2 + $0xc8] sm:$0xff] }
 0x1ae   : > { %v517_v12 = vpop.trf.xlu1 }
 0x1af   : > { %550 = vst.msk [vmem:[#allocation2 + $0xe8] sm:$0xff] %vm2544_vm7, %v517_v12  ;;  %v483_v21 = vpop.trf.xlu0 }
 0x1b0   : > { %945 = vperm.xlu2 %1550, %v903_v11   ;;  %532 = vst.msk [vmem:[#allocation2 + $0x58] sm:$0xff] %vm2544_vm7, %v483_v21  ;;  %v2136_v11 = vadd.s32 56, %v1960_v24 }
 0x1b6   : > { %v518_v15 = vpop.trf.xlu1 }
 0x1b7   : > { %551 = vst.msk [vmem:[#allocation2 + $0xf0] sm:$0xff] %vm2544_vm7, %v518_v15  ;;  %v484_v32 = vpop.trf.xlu0 }
 0x1b8   : > { %950 = vperm.xlu2 %1550, %v904_v14   ;;  %533 = vst.msk [vmem:[#allocation2 + $0x60] sm:$0xff] %vm2544_vm7, %v484_v32 }
 0x1be   : > { %v519_v20 = vpop.trf.xlu1 }
 0x1bf   : > { %552 = vst.msk [vmem:[#allocation2 + $0xf8] sm:$0xff] %vm2544_vm7, %v519_v20  ;;  %v485_v36 = vpop.trf.xlu0 }
 0x1c0   : > { %955 = vperm.xlu2 %1550, %v905_v18   ;;  %534 = vst.msk [vmem:[#allocation2 + $0x68] sm:$0xff] %vm2544_vm7, %v485_v36  ;;  %v911_v36 = vld [vmem:[#allocation2 + $0xd0] sm:$0xff] }
 0x1c2   : > { %v595_v22 = vpop.permute.xlu2 %594 }
 0x1c3   : > { %vm701_vm9 = vcmp.eq.f32.partialorder %v595_v22, %v1992_v23  ;;  %vm669_vm10 = vcmp.gt.f32.partialorder %v595_v22, %v1992_v23  ;;  %vm670_vm12 = vcmp.gt.f32.partialorder %v595_v22, %v1989_v40  ;;  %vm702_vm13 = vcmp.eq.f32.partialorder %v595_v22, %v1989_v40 }
 0x1c4   : > { %vm765_vm11 = vmand %vm701_vm9, %vm733_vm8 }
 0x1c5   : > { %vm797_vm15 = vmor %vm669_vm10, %vm765_vm11  ;;  %vm735_vm10 = vcmp.lt.s32.totalorder %v2055_v42, %v2029_v27 }
 0x1c6   : > { %vm798_vm0 = vmor %vm670_vm12, %vm702_vm13  ;;  %v829_v38 = vsel %vm797_vm15, 1, %v1757_v26  ;;  %vm739_vm15 = vcmp.lt.s32.totalorder %v2062_v48, %v2029_v27 }
 0x1c7   : > { %v830_v41 = vsel %vm798_vm0, 1, %v1757_v26  ;;  %v486_v51 = vpop.trf.xlu0 }
 0x1c8   : > { %960 = vperm.xlu2 %1550, %v906_v25   ;;  %535 = vst.msk [vmem:[#allocation2 + $0x70] sm:$0xff] %vm2544_vm7, %v486_v51  ;;  %v581_v25 = vld [vmem:[#allocation2 + $0x50] sm:$0xff]  ;;  %v912_v51 = vld [vmem:[#allocation2 + $0xd8] sm:$0xff] }
 0x1ca   : > { %v600_v29 = vpop.permute.xlu2 %599 }
 0x1cb   : > { %vm703_vm11 = vcmp.eq.f32.partialorder %v600_v29, %v1992_v23  ;;  %vm671_vm12 = vcmp.gt.f32.partialorder %v600_v29, %v1992_v23  ;;  %vm672_vm13 = vcmp.gt.f32.partialorder %v600_v29, %v1989_v40 }
 0x1cf   : > { %v585_v60 = vld [vmem:[#allocation2 + $0x70] sm:$0xff]  ;;  %v487_v16 = vpop.trf.xlu0 }
 0x1d0   : > { %965 = vperm.xlu2 %1550, %v907_v30   ;;  %659 = vperm.xlu1 %1549, %v585_v60   ;;  %v583_v60 = vld [vmem:[#allocation2 + $0x60] sm:$0xff] }
 0x1d2   : > { %v605_v17 = vpop.permute.xlu2 %604 }
 0x1d3   : > { %vm673_vm1 = vcmp.gt.f32.partialorder %v605_v17, %v1992_v23  ;;  %vm674_vm2 = vcmp.gt.f32.partialorder %v605_v17, %v1989_v40  ;;  %vm705_vm3 = vcmp.eq.f32.partialorder %v605_v17, %v1992_v23  ;;  %vm706_vm6 = vcmp.eq.f32.partialorder %v605_v17, %v1989_v40 }
 0x1d4   : > { %vm769_vm8 = vmand %vm705_vm3, %vm737_vm14  ;;  %vm704_vm14 = vcmp.eq.f32.partialorder %v600_v29, %v1989_v40 }
 0x1d5   : > { %vm801_vm9 = vmor %vm673_vm1, %vm769_vm8 }
 0x1d6   : > { %vm802_vm5 = vmor %vm674_vm2, %vm706_vm6  ;;  %v833_v39 = vsel %vm801_vm9, 1, %v1757_v26  ;;  %vm741_vm2 = vcmp.lt.s32.totalorder %v2065_v50, %v2029_v27 }
 0x1d7   : > { %v834_v44 = vsel %vm802_vm5, 1, %v1757_v26  ;;  %v860_v45 = vadd.s32 %v833_v39, %v829_v38  ;;  %vm767_vm5 = vmand %vm703_vm11, %vm735_vm10  ;;  %v2161_v38 = vadd.s32 128, %v2029_v27  ;;  %v917_v39 = vadd.s32 128, %v1960_v24 }
 0x1d8   : > { %v881_v46 = vadd.s32 %v834_v44, %v830_v41  ;;  %970 = vperm.xlu2 %1550, %v908_v35   ;;  %vm2074_vm1 = vmor %vm671_vm12, %vm767_vm5  ;;  %v582_v44 = vld [vmem:[#allocation2 + $0x58] sm:$0xff] }
 0x1d9   : > { %vm2080_vm3 = vmor %vm672_vm13, %vm704_vm14  ;;  %v831_v2 = vsel %vm2074_vm1, 1, %v1757_v26 }
 0x1da   : > { %v610_v47 = vpop.permute.xlu2 %609  ;;  %v832_v5 = vsel %vm2080_vm3, 1, %v1757_v26 }
 0x1db   : > { %vm707_vm0 = vcmp.eq.f32.partialorder %v610_v47, %v1992_v23  ;;  %vm675_vm12 = vcmp.gt.f32.partialorder %v610_v47, %v1992_v23  ;;  %vm676_vm13 = vcmp.gt.f32.partialorder %v610_v47, %v1989_v40  ;;  %vm708_vm14 = vcmp.eq.f32.partialorder %v610_v47, %v1989_v40 }
 0x1dc   : > { %vm2084_vm6 = vmand %vm707_vm0, %vm739_vm15  ;;  %vm731_vm0 = vcmp.lt.s32.totalorder %v1960_v24, %v2029_v27 }
 0x1e0   : > { %975 = vperm.xlu2 %1550, %v909_v49  }
 0x1e2   : > { %v615_v54 = vpop.permute.xlu2 %614 }
 0x1e3   : > { %vm677_vm8 = vcmp.gt.f32.partialorder %v615_v54, %v1992_v23  ;;  %vm678_vm9 = vcmp.gt.f32.partialorder %v615_v54, %v1989_v40  ;;  %vm709_vm10 = vcmp.eq.f32.partialorder %v615_v54, %v1992_v23  ;;  %vm710_vm11 = vcmp.eq.f32.partialorder %v615_v54, %v1989_v40 }
 0x1e4   : > { %vm773_vm5 = vmand %vm709_vm10, %vm741_vm2 }
 0x1e5   : > { %vm805_vm4 = vmor %vm677_vm8, %vm773_vm5 }
 0x1e6   : > { %vm806_vm15 = vmor %vm678_vm9, %vm710_vm11  ;;  %v837_v58 = vsel %vm805_vm4, 1, %v1757_v26  ;;  %v590_v59 = vpop.permute.xlu1 %589 }
 0x1e7   : > { %vm2103_vm2 = vmor %vm675_vm12, %vm2084_vm6  ;;  %v838_v62 = vsel %vm806_vm15, 1, %v1757_v26  ;;  %v862_v63 = vadd.s32 %v860_v45, %v837_v58  ;;  %vm667_vm8 = vcmp.gt.f32.partialorder %v590_v59, %v1992_v23  ;;  %vm668_vm9 = vcmp.gt.f32.partialorder %v590_v59, %v1989_v40 }
 0x1e8   : > { %vm2111_vm4 = vmor %vm676_vm13, %vm708_vm14  ;;  %v883_v1 = vadd.s32 %v881_v46, %v838_v62  ;;  %vm699_vm6 = vcmp.eq.f32.partialorder %v590_v59, %v1992_v23  ;;  %vm700_vm10 = vcmp.eq.f32.partialorder %v590_v59, %v1989_v40  ;;  %634 = vperm.xlu2 %1550, %v580_v56   ;;  %vm743_vm12 = vcmp.lt.s32.totalorder %v2096_v57, %v2029_v27 }
 0x1e9   : > { %vm763_vm11 = vmand %vm699_vm6, %vm731_vm0  ;;  %v835_v8 = vsel %vm2103_vm2, 1, %v1757_v26  ;;  %v836_v12 = vsel %vm2111_vm4, 1, %v1757_v26  ;;  %vm745_vm2 = vcmp.lt.s32.totalorder %v2136_v11, %v2029_v27  ;;  %v919_v45 = vadd.s32 128, %v2055_v42 }
 0x1ea   : > { %vm795_vm5 = vmor %vm667_vm8, %vm763_vm11  ;;  %v620_v3 = vpop.permute.xlu2 %619  ;;  %v918_v46 = vadd.s32 128, %v2032_v28 }
 0x1eb   : > { %vm796_vm13 = vmor %vm668_vm9, %vm700_vm10  ;;  %v827_v4 = vsel %vm795_vm5, 1, %v1757_v26  ;;  %vm679_vm14 = vcmp.gt.f32.partialorder %v620_v3, %v1992_v23  ;;  %vm680_vm15 = vcmp.gt.f32.partialorder %v620_v3, %v1989_v40  ;;  %vm711_vm7 = vcmp.eq.f32.partialorder %v620_v3, %v1992_v23 }
 0x1ec   : > { %v828_v6 = vsel %vm796_vm13, 1, %v1757_v26  ;;  %v859_v7 = vadd.s32 %v831_v2, %v827_v4  ;;  %vm712_vm1 = vcmp.eq.f32.partialorder %v620_v3, %v1989_v40  ;;  %vm775_vm0 = vmand %vm711_vm7, %vm743_vm12  ;;  %vm2565_vm7 = vcmask 7168   ;;  %v913_v3 = vld [vmem:[#allocation2 + $0xe0] sm:$0xff] }
 0x1ed   : > { %v880_v9 = vadd.s32 %v832_v5, %v828_v6  ;;  %vm807_vm8 = vmor %vm679_vm14, %vm775_vm0  ;;  %536 = vst.msk [vmem:[#allocation2 + $0x78] sm:$0xff] %vm2565_vm7, %v487_v16  ;;  %vm1078_vm13 = vcmp.lt.s32.totalorder %v917_v39, %v2161_v38  ;;  %v922_v4 = vadd.s32 128, %v2065_v50  ;;  %v923_v50 = vadd.s32 128, %v2096_v57 }
 0x1ee   : > { %vm808_vm3 = vmor %vm680_vm15, %vm712_vm1  ;;  %v839_v13 = vsel %vm807_vm8, 1, %v1757_v26  ;;  %v861_v14 = vadd.s32 %v859_v7, %v835_v8  ;;  %vm1082_vm8 = vcmp.lt.s32.totalorder %v919_v45, %v2161_v38  ;;  %v924_v57 = vadd.s32 128, %v2136_v11 }
 0x1ef   : > { %v840_v15 = vsel %vm808_vm3, 1, %v1757_v26  ;;  %v882_v18 = vadd.s32 %v880_v9, %v836_v12 }
 0x1f0   : > { %980 = vperm.xlu2 %1550, %v910_v10   ;;  %v2144_v20 = vadd.s32 %v861_v14, %v839_v13  ;;  %v584_v10 = vld [vmem:[#allocation2 + $0x68] sm:$0xff] }
 0x1f1   : > { %v2148_v21 = vadd.s32 %v882_v18, %v840_v15  ;;  %v914_v18 = vld [vmem:[#allocation2 + $0xe8] sm:$0xff] }
 0x1f2   : > { %v625_v22 = vpop.permute.xlu2 %624 }
 0x1f3   : > { %vm681_vm4 = vcmp.gt.f32.partialorder %v625_v22, %v1992_v23  ;;  %vm682_vm9 = vcmp.gt.f32.partialorder %v625_v22, %v1989_v40  ;;  %vm713_vm6 = vcmp.eq.f32.partialorder %v625_v22, %v1992_v23  ;;  %vm714_vm10 = vcmp.eq.f32.partialorder %v625_v22, %v1989_v40 }
 0x1f4   : > { %vm777_vm11 = vmand %vm713_vm6, %vm745_vm2  ;;  %vm1080_vm6 = vcmp.lt.s32.totalorder %v918_v46, %v2161_v38 }
 0x1f5   : > { %vm809_vm12 = vmor %vm681_vm4, %vm777_vm11 }
 0x1f6   : > { %vm810_vm5 = vmor %vm682_vm9, %vm714_vm10  ;;  %v841_v29 = vsel %vm809_vm12, 1, %v1757_v26 }
 0x1f7   : > { %v842_v30 = vsel %vm810_vm5, 1, %v1757_v26  ;;  %v2156_v32 = vadd.s32 %v862_v63, %v841_v29 }
 0x1f8   : > { %v2158_v17 = vadd.s32 %v883_v1, %v842_v30  ;;  %639 = vperm.xlu2 %1550, %v581_v25   ;;  %v563_v30 = vadd.s32 64, %v1960_v24 }
 0x1fa   : > { %v936_v35 = vpop.permute.xlu2 %935  ;;  %v925_v39 = vadd.s32 128, %v563_v30 }
 0x1fb   : > { %vm1046_vm14 = vcmp.eq.f32.partialorder %v936_v35, %v1989_v40  ;;  %vm1014_vm15 = vcmp.gt.f32.partialorder %v936_v35, %v1989_v40  ;;  %vm1013_vm0 = vcmp.gt.f32.partialorder %v936_v35, %v1992_v23 }
 0x1fc   : > { %vm1110_vm1 = vmand %vm1046_vm14, %vm1078_vm13  ;;  %v1173_v42 = vsel %vm1013_vm0, 1, %v1757_v26  ;;  %vm1084_vm14 = vcmp.lt.s32.totalorder %v920_v52, %v2161_v38 }
 0x1fd   : > { %vm1142_vm3 = vmor %vm1014_vm15, %vm1110_vm1 }
 0x1fe   : > { %v1174_v53 = vsel %vm1142_vm3, 1, %v1757_v26 }
 0x200   : > { %985 = vperm.xlu2 %1550, %v911_v36   ;;  %v915_v36 = vld [vmem:[#allocation2 + $0xf0] sm:$0xff] }
 0x202   : > { %v941_v41 = vpop.permute.xlu2 %940 }
 0x203   : > { %vm1048_vm10 = vcmp.eq.f32.partialorder %v941_v41, %v1989_v40  ;;  %vm1016_vm12 = vcmp.gt.f32.partialorder %v941_v41, %v1989_v40  ;;  %vm1015_vm13 = vcmp.gt.f32.partialorder %v941_v41, %v1992_v23 }
 0x204   : > { %vm1112_vm5 = vmand %vm1048_vm10, %vm1080_vm6  ;;  %v1175_v31 = vsel %vm1015_vm13, 1, %v1757_v26 }
 0x205   : > { %vm1144_vm15 = vmor %vm1016_vm12, %vm1112_vm5  ;;  %vm1088_vm12 = vcmp.lt.s32.totalorder %v922_v4, %v2161_v38 }
 0x206   : > { %v1176_v62 = vsel %vm1144_vm15, 1, %v1757_v26 }
 0x208   : > { %644 = vperm.xlu2 %1550, %v582_v44  }
 0x20a   : > { %v946_v47 = vpop.permute.xlu2 %945 }
 0x20b   : > { %vm1017_vm7 = vcmp.gt.f32.partialorder %v946_v47, %v1992_v23  ;;  %vm1018_vm2 = vcmp.gt.f32.partialorder %v946_v47, %v1989_v40  ;;  %vm1050_vm4 = vcmp.eq.f32.partialorder %v946_v47, %v1989_v40 }
 0x20c   : > { %vm1114_vm9 = vmand %vm1050_vm4, %vm1082_vm8  ;;  %v1177_v49 = vsel %vm1017_vm7, 1, %v1757_v26 }
 0x20d   : > { %vm1146_vm11 = vmor %vm1018_vm2, %vm1114_vm9  ;;  %v1205_v28 = vadd.s32 %v1177_v49, %v1173_v42  ;;  %vm1086_vm2 = vcmp.lt.s32.totalorder %v921_v61, %v2161_v38  ;;  %v916_v42 = vld [vmem:[#allocation2 + $0xf8] sm:$0xff]  ;;  %v564_v49 = vadd.s32 72, %v1960_v24 }
 0x20e   : > { %v1178_v54 = vsel %vm1146_vm11, 1, %v1757_v26 }
 0x20f   : > { %v1226_v55 = vadd.s32 %v1178_v54, %v1174_v53  ;;  %v586_v54 = vld [vmem:[#allocation2 + $0x78] sm:$0xff] }
 0x210   : > { %990 = vperm.xlu2 %1550, %v912_v51  }
 0x212   : > { %v951_v56 = vpop.permute.xlu2 %950  ;;  %v630_v53 = vpop.permute.xlu0 %629 }
 0x213   : > { %vm1019_vm1 = vcmp.gt.f32.partialorder %v951_v56, %v1992_v23  ;;  %vm1020_vm0 = vcmp.gt.f32.partialorder %v951_v56, %v1989_v40  ;;  %vm1052_vm8 = vcmp.eq.f32.partialorder %v951_v56, %v1989_v40 }
 0x214   : > { %vm1116_vm3 = vmand %vm1052_vm8, %vm1084_vm14  ;;  %v1179_v58 = vsel %vm1019_vm1, 1, %v1757_v26 }
 0x215   : > { %vm1148_vm7 = vmor %vm1020_vm0, %vm1116_vm3  ;;  %v1206_v59 = vadd.s32 %v1179_v58, %v1175_v31  ;;  %vm1090_vm0 = vcmp.lt.s32.totalorder %v923_v50, %v2161_v38 }
 0x216   : > { %v1180_v63 = vsel %vm1148_vm7, 1, %v1757_v26 }
 0x217   : > { %v1227_v0 = vadd.s32 %v1180_v63, %v1176_v62 }
 0x218   : > { %649 = vperm.xlu2 %1550, %v583_v60  }
 0x21a   : > { %v956_v1 = vpop.permute.xlu2 %955 }
 0x21b   : > { %vm1021_vm4 = vcmp.gt.f32.partialorder %v956_v1, %v1992_v23  ;;  %vm1022_vm9 = vcmp.gt.f32.partialorder %v956_v1, %v1989_v40  ;;  %vm1054_vm6 = vcmp.eq.f32.partialorder %v956_v1, %v1989_v40 }
 0x21c   : > { %vm1118_vm10 = vmand %vm1054_vm6, %vm1086_vm2  ;;  %v1181_v2 = vsel %vm1021_vm4, 1, %v1757_v26 }
 0x21d   : > { %vm1150_vm11 = vmor %vm1022_vm9, %vm1118_vm10  ;;  %v1207_v48 = vadd.s32 %v1205_v28, %v1181_v2  ;;  %vm1092_vm9 = vcmp.lt.s32.totalorder %v924_v57, %v2161_v38 }
 0x21e   : > { %v1182_v5 = vsel %vm1150_vm11, 1, %v1757_v26 }
 0x21f   : > { %v1228_v6 = vadd.s32 %v1226_v55, %v1182_v5  ;;  %v926_v55 = vadd.s32 128, %v564_v49 }
 0x220   : > { %995 = vperm.xlu2 %1550, %v913_v3  }
 0x222   : > { %v961_v7 = vpop.permute.xlu2 %960 }
 0x223   : > { %vm1023_vm5 = vcmp.gt.f32.partialorder %v961_v7, %v1992_v23  ;;  %vm1024_vm13 = vcmp.gt.f32.partialorder %v961_v7, %v1989_v40  ;;  %vm1056_vm14 = vcmp.eq.f32.partialorder %v961_v7, %v1989_v40 }
 0x224   : > { %vm1120_vm15 = vmand %vm1056_vm14, %vm1088_vm12  ;;  %v1183_v8 = vsel %vm1023_vm5, 1, %v1757_v26 }
 0x225   : > { %vm1152_vm1 = vmor %vm1024_vm13, %vm1120_vm15  ;;  %v1208_v9 = vadd.s32 %v1206_v59, %v1183_v8  ;;  %vm1094_vm13 = vcmp.lt.s32.totalorder %v925_v39, %v2161_v38 }
 0x226   : > { %v1184_v12 = vsel %vm1152_vm1, 1, %v1757_v26 }
 0x227   : > { %v1229_v13 = vadd.s32 %v1227_v0, %v1184_v12  ;;  %v565_v0 = vadd.s32 80, %v1960_v24 }
 0x228   : > { %654 = vperm.xlu2 %1550, %v584_v10  }
 0x229   : > { %v927_v50 = vadd.s32 128, %v565_v0 }
 0x22a   : > { %v966_v14 = vpop.permute.xlu2 %965 }
 0x22b   : > { %vm1025_vm8 = vcmp.gt.f32.partialorder %v966_v14, %v1992_v23  ;;  %vm1026_vm3 = vcmp.gt.f32.partialorder %v966_v14, %v1989_v40  ;;  %vm1058_vm7 = vcmp.eq.f32.partialorder %v966_v14, %v1989_v40 }
 0x22c   : > { %vm1122_vm2 = vmand %vm1058_vm7, %vm1090_vm0  ;;  %v1185_v15 = vsel %vm1025_vm8, 1, %v1757_v26 }
 0x22d   : > { %vm1154_vm4 = vmor %vm1026_vm3, %vm1122_vm2  ;;  %v1209_v16 = vadd.s32 %v1207_v48, %v1185_v15  ;;  %vm749_vm3 = vcmp.lt.s32.totalorder %v564_v49, %v2029_v27  ;;  %v569_v49 = vadd.s32 112, %v1960_v24 }
 0x22e   : > { %v1186_v22 = vsel %vm1154_vm4, 1, %v1757_v26 }
 0x22f   : > { %v1230_v25 = vadd.s32 %v1228_v6, %v1186_v22 }
 0x230   : > { %1000 = vperm.xlu2 %1550, %v914_v18  }
 0x232   : > { %v971_v29 = vpop.permute.xlu2 %970 }
 0x233   : > { %vm1027_vm6 = vcmp.gt.f32.partialorder %v971_v29, %v1992_v23  ;;  %vm1028_vm10 = vcmp.gt.f32.partialorder %v971_v29, %v1989_v40  ;;  %vm1060_vm11 = vcmp.eq.f32.partialorder %v971_v29, %v1989_v40 }
 0x234   : > { %vm1124_vm12 = vmand %vm1060_vm11, %vm1092_vm9  ;;  %v1187_v35 = vsel %vm1027_vm6, 1, %v1757_v26 }
 0x235   : > { %vm1156_vm5 = vmor %vm1028_vm10, %vm1124_vm12  ;;  %v1210_v11 = vadd.s32 %v1208_v9, %v1187_v35  ;;  %vm747_vm12 = vcmp.lt.s32.totalorder %v563_v30, %v2029_v27 }
 0x236   : > { %v1188_v41 = vsel %vm1156_vm5, 1, %v1757_v26  ;;  %vm715_vm5 = vcmp.eq.f32.partialorder %v630_v53, %v1992_v23 }
 0x237   : > { %v1231_v44 = vadd.s32 %v1229_v13, %v1188_v41  ;;  %v566_v41 = vadd.s32 88, %v1960_v24 }
 0x238   : > { %1005 = vperm.xlu2 %1550, %v915_v36  }
 0x23a   : > { %v976_v45 = vpop.permute.xlu2 %975 }
 0x23b   : > { %vm1029_vm14 = vcmp.gt.f32.partialorder %v976_v45, %v1992_v23  ;;  %vm1030_vm15 = vcmp.gt.f32.partialorder %v976_v45, %v1989_v40  ;;  %vm1062_vm1 = vcmp.eq.f32.partialorder %v976_v45, %v1989_v40  ;;  %v567_v45 = vadd.s32 96, %v1960_v24 }
 0x23c   : > { %vm1126_vm0 = vmand %vm1062_vm1, %vm1094_vm13  ;;  %v1189_v46 = vsel %vm1029_vm14, 1, %v1757_v26  ;;  %vm1096_vm13 = vcmp.lt.s32.totalorder %v926_v55, %v2161_v38  ;;  %vm683_vm14 = vcmp.gt.f32.partialorder %v630_v53, %v1992_v23  ;;  %v2328_v55 = vadd.s32 120, %v1960_v24 }
 0x23d   : > { %vm1158_vm8 = vmor %vm1030_vm15, %vm1126_vm0  ;;  %v2225_v47 = vadd.s32 %v1209_v16, %v1189_v46  ;;  %vm2566_vm15 = vcmp.gt.s32.totalorder %v1954_v19, 0 }
 0x23e   : > { %v1190_v28 = vsel %vm1158_vm8, 1, %v1757_v26  ;;  %v339_v61 = vsel %vm2566_vm15, 1, %v1757_v26  ;;  %vm779_vm1 = vmand %vm715_vm5, %vm747_vm12  ;;  %vm751_vm5 = vcmp.lt.s32.totalorder %v565_v0, %v2029_v27 }
 0x23f   : > { %v2229_v51 = vadd.s32 %v1230_v25, %v1190_v28  ;;  %v1250_v62 = vperm.slane %v339_v61, 1 }
 0x240   : > { %1010 = vperm.xlu2 %1550, %v916_v42   ;;  %v568_v42 = vadd.s32 104, %v1960_v24 }
 0x242   : > { %v635_v52 = vpop.permute.xlu2 %634  ;;  %v930_v28 = vadd.s32 128, %v568_v42 }
 0x243   : > { %vm685_vm7 = vcmp.gt.f32.partialorder %v635_v52, %v1992_v23  ;;  %vm686_vm2 = vcmp.gt.f32.partialorder %v635_v52, %v1989_v40  ;;  %vm717_vm4 = vcmp.eq.f32.partialorder %v635_v52, %v1992_v23  ;;  %vm718_vm9 = vcmp.eq.f32.partialorder %v635_v52, %v1989_v40 }
 0x244   : > { %vm781_vm6 = vmand %vm717_vm4, %vm749_vm3  ;;  %v2569_v52 = vmov 0 }
 0x245   : > { %vm813_vm10 = vmor %vm685_vm7, %vm781_vm6  ;;  %vm684_vm7 = vcmp.gt.f32.partialorder %v630_v53, %v1989_v40  ;;  %vm2567_vm6 = vcmask 1040384  }
 0x246   : > { %vm814_vm11 = vmor %vm686_vm2, %vm718_vm9  ;;  %v845_v56 = vsel %vm813_vm10, 1, %v1757_v26  ;;  %vm716_vm2 = vcmp.eq.f32.partialorder %v630_v53, %v1989_v40 }
 0x247   : > { %v846_v31 = vsel %vm814_vm11, 1, %v1757_v26  ;;  %v2239_v58 = vadd.s32 %v2156_v32, %v845_v56  ;;  %v1249_v32 = vperm.slane %v339_v61, 0  ;;  %vm811_vm10 = vmor %vm683_vm14, %vm779_vm1  ;;  %v932_v61 = vadd.s32 128, %v2328_v55 }
 0x248   : > { %v2244_v59 = vadd.s32 %v2158_v17, %v846_v31  ;;  %664 = vperm.xlu2 %1550, %v586_v54   ;;  %vm2568_vm11 = vmmov %vm2567_vm6  ;;  %v843_v6 = vsel %vm811_vm10, 1, %v1757_v26  ;;  %v2323_v54 = vpop.permute.xlu1 %659  ;;  %v2573_v31 = vmov 0 }
 0x249   : > { %v1251_v1 = vsel %vm2567_vm6, %v1249_v32, 0  ;;  %v1252_v48 = vsel %vm2568_vm11, %v1250_v62, 0  ;;  %vm812_vm12 = vmor %vm684_vm7, %vm716_vm2  ;;  %v865_v10 = vadd.s32 %v2144_v20, %v843_v6  ;;  %vm1098_vm7 = vcmp.lt.s32.totalorder %v927_v50, %v2161_v38 }
 0x24a   : > { %v981_v60 = vpop.permute.xlu2 %980  ;;  %v1253_v4 = vadd.s32 %v1252_v48, %v1251_v1  ;;  %v844_v7 = vsel %vm812_vm12, 1, %v1757_v26 }
 0x24b   : > { %vm1031_vm0 = vcmp.gt.f32.partialorder %v981_v60, %v1992_v23  ;;  %vm1032_vm8 = vcmp.gt.f32.partialorder %v981_v60, %v1989_v40  ;;  %vm1064_vm3 = vcmp.eq.f32.partialorder %v981_v60, %v1989_v40  ;;  %v886_v12 = vadd.s32 %v2148_v21, %v844_v7 }
 0x24c   : > { %vm1128_vm4 = vmand %vm1064_vm3, %vm1096_vm13  ;;  %v1191_v17 = vsel %vm1031_vm0, 1, %v1757_v26  ;;  %v1255_v5 = vshrl.u32 %v1253_v4, 16  ;;  %v1254_v29 = vand.u32 65535, %v1253_v4 }
 0x24d   : > { %vm1160_vm9 = vmor %vm1032_vm8, %vm1128_vm4  ;;  %v2257_v63 = vadd.s32 %v1210_v11, %v1191_v17 }
 0x24e   : > { %v1192_v2 = vsel %vm1160_vm9, 1, %v1757_v26  ;;  %v1257_v9 = vcvt.s32.f32 %v1255_v5  ;;  %v1256_v35 = vcvt.s32.f32 %v1254_v29 }
 0x24f   : > { %v2265_v3 = vadd.s32 %v1231_v44, %v1192_v2  ;;  %v928_v44 = vadd.s32 128, %v566_v41 }
 0x250   : > { %1260 = vadd.xlane.f32.xlu1 %v1257_v9 }
 0x251   : > { %vm1100_vm11 = vcmp.lt.s32.totalorder %v928_v44, %v2161_v38 }
 0x252   : > { %v640_v8 = vpop.permute.xlu2 %639 }
 0x253   : > { %vm687_vm13 = vcmp.gt.f32.partialorder %v640_v8, %v1992_v23  ;;  %vm688_vm14 = vcmp.gt.f32.partialorder %v640_v8, %v1989_v40  ;;  %vm719_vm15 = vcmp.eq.f32.partialorder %v640_v8, %v1992_v23  ;;  %vm720_vm1 = vcmp.eq.f32.partialorder %v640_v8, %v1989_v40 }
 0x254   : > { %vm783_vm0 = vmand %vm719_vm15, %vm751_vm5  ;;  %vm753_vm5 = vcmp.lt.s32.totalorder %v566_v41, %v2029_v27 }
 0x255   : > { %vm815_vm8 = vmor %vm687_vm13, %vm783_vm0 }
 0x256   : > { %vm816_vm3 = vmor %vm688_vm14, %vm720_vm1  ;;  %v847_v13 = vsel %vm815_vm8, 1, %v1757_v26 }
 0x257   : > { %v848_v14 = vsel %vm816_vm3, 1, %v1757_v26  ;;  %v2278_v15 = vadd.s32 %v865_v10, %v847_v13  ;;  %vm755_vm3 = vcmp.lt.s32.totalorder %v567_v45, %v2029_v27 }
 0x258   : > { %v2280_v16 = vadd.s32 %v886_v12, %v848_v14 }
 0x25a   : > { %v986_v18 = vpop.permute.xlu2 %985 }
 0x25b   : > { %vm1033_vm2 = vcmp.gt.f32.partialorder %v986_v18, %v1992_v23  ;;  %vm1034_vm4 = vcmp.gt.f32.partialorder %v986_v18, %v1989_v40  ;;  %vm1066_vm9 = vcmp.eq.f32.partialorder %v986_v18, %v1989_v40 }
 0x25c   : > { %vm1130_vm6 = vmand %vm1066_vm9, %vm1098_vm7  ;;  %v1193_v20 = vsel %vm1033_vm2, 1, %v1757_v26 }
 0x25d   : > { %vm1162_vm10 = vmor %vm1034_vm4, %vm1130_vm6  ;;  %v2288_v21 = vadd.s32 %v2225_v47, %v1193_v20  ;;  %v929_v47 = vadd.s32 128, %v567_v45  ;;  %vm1104_vm4 = vcmp.lt.s32.totalorder %v930_v28, %v2161_v38 }
 0x25e   : > { %v1194_v57 = vsel %vm1162_vm10, 1, %v1757_v26 }
 0x25f   : > { %v2292_v22 = vadd.s32 %v2229_v51, %v1194_v57  ;;  %vm1102_vm1 = vcmp.lt.s32.totalorder %v929_v47, %v2161_v38  ;;  %v931_v51 = vadd.s32 128, %v569_v49 }
 0x262   : > { %v2294_v25 = vpop.permute.xlu2 %644 }
 0x263   : > { %vm721_vm13 = vcmp.eq.f32.partialorder %v2294_v25, %v1992_v23 }
 0x264   : > { %vm2312_vm8 = vmand %vm721_vm13, %vm753_vm5  ;;  %vm1106_vm5 = vcmp.lt.s32.totalorder %v931_v51, %v2161_v38 }
 0x265   : > { %v2570_v52 = vsel %vm2312_vm8, 4294967295, %v2569_v52 }
 0x26a   : > { %v991_v30 = vpop.permute.xlu2 %990 }
 0x26b   : > { %vm1068_vm12 = vcmp.eq.f32.partialorder %v991_v30, %v1989_v40  ;;  %vm1036_vm14 = vcmp.gt.f32.partialorder %v991_v30, %v1989_v40 }
 0x26c   : > { %vm1132_vm15 = vmand %vm1068_vm12, %vm1100_vm11  ;;  %vm1035_vm11 = vcmp.gt.f32.partialorder %v991_v30, %v1992_v23 }
 0x26d   : > { %vm2319_vm2 = vmor %vm1036_vm14, %vm1132_vm15  ;;  %vm759_vm14 = vcmp.lt.s32.totalorder %v569_v49, %v2029_v27  ;;  %vm727_vm15 = vcmp.eq.f32.partialorder %v2323_v54, %v1992_v23  ;;  %v1195_v32 = vsel %vm1035_vm11, 1, %v1757_v26  ;;  %vm757_vm11 = vcmp.lt.s32.totalorder %v568_v42, %v2029_v27 }
 0x26e   : > { %v1196_v17 = vsel %vm2319_vm2, 1, %v1757_v26  ;;  %v1214_v4 = vadd.s32 %v2257_v63, %v1195_v32 }
 0x26f   : > { %v1235_v5 = vadd.s32 %v2265_v3, %v1196_v17 }
 0x271   : > { %1258 = vadd.xlane.f32.xlu2 %v1256_v35 }
 0x272   : > { %v2296_v11 = vpop.permute.xlu2 %649 }
 0x273   : > { %vm723_vm7 = vcmp.eq.f32.partialorder %v2296_v11, %v1992_v23 }
 0x274   : > { %vm2332_vm12 = vmand %vm723_vm7, %vm755_vm3  ;;  %vm689_vm3 = vcmp.gt.f32.partialorder %v2294_v25, %v1992_v23 }
 0x275   : > { %v2574_v31 = vsel %vm2332_vm12, 4294967295, %v2573_v31 }
 0x27a   : > { %v996_v36 = vpop.permute.xlu2 %995 }
 0x27b   : > { %vm1070_vm0 = vcmp.eq.f32.partialorder %v996_v36, %v1989_v40  ;;  %vm1038_vm6 = vcmp.gt.f32.partialorder %v996_v36, %v1989_v40  ;;  %vm1037_vm8 = vcmp.gt.f32.partialorder %v996_v36, %v1992_v23 }
 0x27c   : > { %vm1134_vm10 = vmand %vm1070_vm0, %vm1102_vm1  ;;  %v1197_v1 = vsel %vm1037_vm8, 1, %v1757_v26 }
 0x27d   : > { %vm2345_vm7 = vmor %vm1038_vm6, %vm1134_vm10  ;;  %vm691_vm6 = vcmp.gt.f32.partialorder %v2296_v11, %v1992_v23  ;;  %v1215_v3 = vadd.s32 %v2288_v21, %v1197_v1 }
 0x27e   : > { %vm2362_vm10 = vmand %vm727_vm15, %vm759_vm14  ;;  %v1198_v6 = vsel %vm2345_vm7, 1, %v1757_v26 }
 0x27f   : > { %v1236_v12 = vadd.s32 %v2292_v22, %v1198_v6 }
 0x282   : > { %v2298_v39 = vpop.permute.xlu2 %654 }
 0x283   : > { %vm725_vm8 = vcmp.eq.f32.partialorder %v2298_v39, %v1992_v23 }
 0x284   : > { %vm2413_vm7 = vmand %vm725_vm8, %vm757_vm11  ;;  %vm693_vm11 = vcmp.gt.f32.partialorder %v2298_v39, %v1992_v23  ;;  %vm2591_vm8 = vcmp.gt.f32.partialorder %v2294_v25, %v1989_v40 }
 0x28a   : > { %v1001_v46 = vpop.permute.xlu2 %1000 }
 0x28b   : > { %vm1072_vm9 = vcmp.eq.f32.partialorder %v1001_v46, %v1989_v40  ;;  %vm1040_vm1 = vcmp.gt.f32.partialorder %v1001_v46, %v1989_v40  ;;  %vm2584_vm15 = vcmp.gt.f32.partialorder %v1001_v46, %v1992_v23 }
 0x28c   : > { %vm1136_vm0 = vmand %vm1072_vm9, %vm1104_vm4  ;;  %vm2581_vm4 = vnez %v2570_v52  ;;  %v1199_v48 = vsel %vm2584_vm15, 1, %v1757_v26  ;;  %vm2586_vm15 = vnez %v2574_v31 }
 0x28d   : > { %vm1168_vm12 = vmor %vm1040_vm1, %vm1136_vm0  ;;  %v1216_v50 = vadd.s32 %v1214_v4, %v1199_v48 }
 0x28e   : > { %vm2378_vm14 = vmor %vm689_vm3, %vm2581_vm4  ;;  %vm1108_vm3 = vcmp.lt.s32.totalorder %v932_v61, %v2161_v38  ;;  %v1200_v7 = vsel %vm1168_vm12, 1, %v1757_v26 }
 0x28f   : > { %v1237_v18 = vadd.s32 %v1235_v5, %v1200_v7  ;;  %v849_v57 = vsel %vm2378_vm14, 1, %v1757_v26  ;;  %vm728_vm14 = vcmp.eq.f32.partialorder %v2323_v54, %v1989_v40 }
 0x290   : > { %v868_v36 = vadd.s32 %v2239_v58, %v849_v57 }
 0x292   : > { %v1006_v56 = vpop.permute.xlu2 %1005 }
 0x293   : > { %vm1074_vm13 = vcmp.eq.f32.partialorder %v1006_v56, %v1989_v40  ;;  %vm1041_vm2 = vcmp.gt.f32.partialorder %v1006_v56, %v1992_v23  ;;  %vm2585_vm1 = vcmp.gt.f32.partialorder %v1006_v56, %v1989_v40 }
 0x294   : > { %vm2356_vm9 = vmand %vm1074_vm13, %vm1106_vm5  ;;  %vm722_vm13 = vcmp.eq.f32.partialorder %v2294_v25, %v1989_v40  ;;  %v1201_v8 = vsel %vm1041_vm2, 1, %v1757_v26 }
 0x295   : > { %vm1170_vm0 = vmor %vm2585_vm1, %vm2356_vm9  ;;  %v1217_v20 = vadd.s32 %v1215_v3, %v1201_v8 }
 0x296   : > { %vm2404_vm5 = vmor %vm691_vm6, %vm2586_vm15  ;;  %vm724_vm15 = vcmp.eq.f32.partialorder %v2296_v11, %v1989_v40  ;;  %v1202_v13 = vsel %vm1170_vm0, 1, %v1757_v26  ;;  %vm695_vm0 = vcmp.gt.f32.partialorder %v2323_v54, %v1992_v23 }
 0x297   : > { %vm818_vm4 = vmor %vm2591_vm8, %vm722_vm13  ;;  %vm2592_vm13 = vcmp.gt.f32.partialorder %v2296_v11, %v1989_v40  ;;  %v1238_v22 = vadd.s32 %v1236_v12, %v1202_v13  ;;  %v851_v30 = vsel %vm2404_vm5, 1, %v1757_v26 }
 0x298   : > { %v850_v35 = vsel %vm818_vm4, 1, %v1757_v26  ;;  %vm823_vm5 = vmor %vm695_vm0, %vm2362_vm10  ;;  %v869_v45 = vadd.s32 %v2278_v15, %v851_v30 }
 0x299   : > { %v889_v42 = vadd.s32 %v2244_v59, %v850_v35  ;;  %v855_v15 = vsel %vm823_vm5, 1, %v1757_v26 }
 0x29a   : > { %v1011_v9 = vpop.permute.xlu2 %1010 }
 0x29b   : > { %vm1043_vm9 = vcmp.gt.f32.partialorder %v1011_v9, %v1992_v23  ;;  %vm1044_vm6 = vcmp.gt.f32.partialorder %v1011_v9, %v1989_v40  ;;  %vm1076_vm1 = vcmp.eq.f32.partialorder %v1011_v9, %v1989_v40 }
 0x29c   : > { %vm1140_vm12 = vmand %vm1076_vm1, %vm1108_vm3  ;;  %v1203_v14 = vsel %vm1043_vm9, 1, %v1757_v26  ;;  %vm694_vm3 = vcmp.gt.f32.partialorder %v2298_v39, %v1989_v40  ;;  %vm726_vm9 = vcmp.eq.f32.partialorder %v2298_v39, %v1989_v40  ;;  %vm696_vm1 = vcmp.gt.f32.partialorder %v2323_v54, %v1989_v40 }
 0x29d   : > { %vm1172_vm2 = vmor %vm1044_vm6, %vm1140_vm12  ;;  %v1218_v21 = vadd.s32 %v1216_v50, %v1203_v14 }
 0x29e   : > { %v1204_v38 = vsel %vm1172_vm2, 1, %v1757_v26  ;;  %vm820_vm6 = vmor %vm2592_vm13, %vm724_vm15  ;;  %vm761_vm2 = vcmp.lt.s32.totalorder %v2328_v55, %v2029_v27 }
 0x29f   : > { %v1219_v25 = vadd.s32 %v1218_v21, %v1217_v20  ;;  %v1239_v29 = vadd.s32 %v1237_v18, %v1204_v38  ;;  %vm821_vm12 = vmor %vm693_vm11, %vm2413_vm7  ;;  %v852_v41 = vsel %vm820_vm6, 1, %v1757_v26 }
 0x2a0   : > { %vm822_vm15 = vmor %vm694_vm3, %vm726_vm9  ;;  %v853_v46 = vsel %vm821_vm12, 1, %v1757_v26  ;;  %v890_v27 = vadd.s32 %v2280_v16, %v852_v41 }
 0x2a1   : > { %v1240_v11 = vadd.s32 %v1239_v29, %v1238_v22  ;;  %v1220_v44 = vrot.slane %v1219_v25, 4  ;;  %vm824_vm4 = vmor %vm696_vm1, %vm728_vm14  ;;  %v854_v58 = vsel %vm822_vm15, 1, %v1757_v26  ;;  %v870_v28 = vadd.s32 %v868_v36, %v853_v46 }
 0x2a2   : > { %v665_v39 = vpop.permute.xlu2 %664  ;;  %v856_v49 = vsel %vm824_vm4, 1, %v1757_v26  ;;  %v891_v52 = vadd.s32 %v889_v42, %v854_v58  ;;  %vm2593_vm14 = vcmask 1040384   ;;  %vm2594_vm15 = vcmp.gt.s32.totalorder %v1954_v19, 0 }
 0x2a3   : > { %v1241_v47 = vrot.slane %v1240_v11, 4  ;;  %vm697_vm7 = vcmp.gt.f32.partialorder %v665_v39, %v1992_v23  ;;  %vm698_vm11 = vcmp.gt.f32.partialorder %v665_v39, %v1989_v40  ;;  %vm729_vm8 = vcmp.eq.f32.partialorder %v665_v39, %v1992_v23 }
 0x2a4   : > { %vm730_vm10 = vcmp.eq.f32.partialorder %v665_v39, %v1989_v40  ;;  %vm793_vm0 = vmand %vm729_vm8, %vm761_vm2  ;;  %v1221_v51 = vadd.s32 %v1220_v44, %v1219_v25  ;;  %v871_v23 = vadd.s32 %v869_v45, %v855_v15  ;;  %v892_v59 = vadd.s32 %v890_v27, %v856_v49 }
 0x2a5   : > { %vm825_vm3 = vmor %vm697_vm7, %vm793_vm0  ;;  %v1242_v53 = vadd.s32 %v1241_v47, %v1240_v11  ;;  %vm1294_vm7 = vcmp.eq.s32.totalorder %v1960_v24, 2  ;;  %vm1292_vm8 = vcmp.eq.s32.totalorder %v1960_v24, 0 }
 0x2a6   : > { %vm826_vm9 = vmor %vm698_vm11, %vm730_vm10  ;;  %v857_v54 = vsel %vm825_vm3, 1, %v1757_v26  ;;  %v1222_v16 = vrot.slane %v1221_v51, 2  ;;  %vm1293_vm11 = vcmp.eq.s32.totalorder %v1960_v24, 1 }
 0x2a7   : > { %v858_v40 = vsel %vm826_vm9, 1, %v1757_v26  ;;  %v872_v55 = vadd.s32 %v870_v28, %v857_v54  ;;  %v1243_v60 = vrot.slane %v1242_v53, 2  ;;  %vm2595_vm2 = vmmov %vm2593_vm14 }
 0x2a8   : > { %v893_v56 = vadd.s32 %v891_v52, %v858_v40  ;;  %v1223_v62 = vadd.s32 %v1222_v16, %v1221_v51  ;;  %vm2596_vm4 = vmmov %vm2595_vm2 }
 0x2a9   : > { %v873_v31 = vadd.s32 %v872_v55, %v871_v23  ;;  %v1244_v1 = vadd.s32 %v1243_v60, %v1242_v53 }
 0x2aa   : > { %v894_v61 = vadd.s32 %v893_v56, %v892_v59  ;;  %v1224_v5 = vrot.slane %v1223_v62, 1 }
 0x2ab   : > { %v874_v32 = vrot.slane %v873_v31, 4  ;;  %v1245_v63 = vrot.slane %v1244_v1, 1 }
 0x2ac   : > { %v895_v17 = vrot.slane %v894_v61, 4  ;;  %v1225_v9 = vadd.s32 %v1224_v5, %v1223_v62 }
 0x2ad   : > { %v875_v0 = vadd.s32 %v874_v32, %v873_v31  ;;  %v1246_v50 = vadd.s32 %v1245_v63, %v1244_v1 }
 0x2ae   : > { %v896_v2 = vadd.s32 %v895_v17, %v894_v61 }
 0x2af   : > { %v876_v48 = vrot.slane %v875_v0, 2 }
 0x2b0   : > { %v897_v4 = vrot.slane %v896_v2, 2 }
 0x2b1   : > { %v877_v6 = vadd.s32 %v876_v48, %v875_v0 }
 0x2b2   : > { %v898_v3 = vadd.s32 %v897_v4, %v896_v2 }
 0x2b3   : > { %v878_v7 = vrot.slane %v877_v6, 1 }
 0x2b4   : > { %v899_v8 = vrot.slane %v898_v3, 1 }
 0x2b5   : > { %v879_v10 = vadd.s32 %v878_v7, %v877_v6 }
 0x2b6   : > { %v900_v12 = vadd.s32 %v899_v8, %v898_v3 }
 0x2b7   : > { %v1247_v13 = vadd.s32 %v1225_v9, %v879_v10 }
 0x2b8   : > { %v1248_v14 = vadd.s32 %v1246_v50, %v900_v12 }
 0x2c3   : > { %v1261_v18 = vpop.xlane.xlu1 %1260 }
 0x2c4   : > { %v1263_v20 = vcvt.f32.s32 %v1261_v18 }
 0x2c6   : > { %v1264_v21 = vshll.u32 %v1263_v20, 16 }
 0x2e4   : > { %v1259_v38 = vpop.xlane.xlu2 %1258 }
 0x2e5   : > { %v1262_v57 = vcvt.f32.s32 %v1259_v38 }
 0x2e7   : > { %v1265_v22 = vadd.s32 %v1264_v21, %v1262_v57 }
 0x2e9   : > { %v1266_v25 = vmul.u32 3, %v1265_v22  ;;  %v1291_v42 = vcvt.s32.f32 %v1265_v22 }
 0x2eb   : > { %vm1267_vm13 = vcmp.lt.s32.totalorder %v1266_v25, 256  ;;  %v1295_v19 = vperm.slane %v1291_v42, 0 }
 0x2ec   : > { %v1268_v29 = vsel %vm1267_vm13, %v1266_v25, 256 }
 0x2ed   : > { %vm1269_vm6 = vcmp.lt.s32.totalorder %v1247_v13, %v1268_v29  ;;  %vm1270_vm1 = vcmp.lt.s32.totalorder %v1248_v14, %v1268_v29  ;;  %v1296_v27 = vsel %vm1294_vm7, %v1295_v19, 0.0 }
 0x2ee   : > { %v1272_v30 = vsel %vm1270_vm1, 1, %v1757_v26  ;;  %v1271_v11 = vsel %vm1269_vm6, 1, %v1757_v26 }
 0x2ef   : > { %v1273_v35 = vrot.slane %v1272_v30, 7 }
 0x2f1   : > { %v1274_v36 = vsel %vm2593_vm14, %v1271_v11, %v1273_v35 }
 0x2f2   : > { %vm1275_vm12 = vcmp.ne.s32.totalorder %v1274_v36, 0 }
 0x2f3   : > { %vm1276_vm5 = vmor %vm2594_vm15, %vm1275_vm12 }
 0x2f4   : > { %v1478_v41 = vsel %vm1276_vm5, 1.0, %v1756_v37 }
 0x2f5   : > { %v1280_v44 = vperm.slane %v1478_v41, 0  ;;  %v1281_v39 = vperm.slane %v1478_v41, 1 }
 0x2f7   : > { %v1284_v45 = vmul.f32 %v1280_v44, %v1979_v33  ;;  %v1285_v46 = vmul.f32 %v1281_v39, %v1981_v34  ;;  %v1299_v34 = vperm.slane %v1999_v43, 0 }
 0x2f9   : > { %v1286_v47 = vsel %vm2595_vm2, %v1284_v45, 0.0  ;;  %v1287_v58 = vsel %vm2596_vm4, %v1285_v46, 0.0 }
 0x2fa   : > { %v1288_v26 = vadd.f32 %v1287_v58, %v1286_v47 }
 0x2fc   : > { %1289 = vadd.xlane.f32.xlu1 %v1288_v26 }
 0x36f   : > { %v1290_v37 = vpop.xlane.xlu1 %1289 }
 0x370   : > { %v1297_v33 = vperm.slane %v1290_v37, 0 }
 0x372   : > { %v1298_v15 = vsel %vm1293_vm11, %v1297_v33, %v1296_v27 }
 0x373   : > { %v1300_v49 = vsel %vm1292_vm8, %v1299_v34, %v1298_v15 }
 0x374   : > { %1301 = vst [vmem:[%s331_s21] sm:$0xff] %v1300_v49 }
 0x375   : > { %1707 = shalt.err (!%p1704_p7)
}
 0x376   : > { %1494 = dma.vmem_to_hbm [thread:$0]  (%p1829_p11), %s1316_s13, 128, %s1318_s12, %s1303_s19  }
 0x377 PF: > { %s1329_s28 = sand.u32 1, %s1742_s15   ;;  %p1510_p0 = pnand %p1456_p9, %p1833_p12 }
 0x378   : > { %s1330_s10 = scalar_lea.sflag [#allocation5], %s1329_s28 }
 0x379   : > { %p1511_p8 = pneg %p1510_p0 }
 0x37b   : > { %1737 = dma.done.wait (%p1511_p8), %s1330_s10, 128  }
 0x37c   : > { %1739 = vsyncadd (%p1511_p8), %s1330_s10, 4294967168  ;;  %s2597_s18 = sld [smem:[#allocation17_spill]]  ;;  %s2600_s15 = smov %s1746_s16 }
 0x37d   : > { %s2598_s22 = sld [smem:[#allocation16_spill]] }
 0x37e   : > { %s2599_s17 = sld [smem:[#allocation18_spill]] }
 0x382   : > { %p23_p10 = scmp.ge.s32.totalorder %s2597_s18, 4  }
 0x383   : > { %s2601_s16 = smov %s2598_s22 }
 0x384   :  { %25 = sbr.rel (!%p23_p10) target bundleno = 11 (0xb), region = 118 }
 0x389   :  { %1336 = vsyncpa [#allocation4], 1 }
 0x38a   :  { %1338 = vsyncpa [#allocation4 + $0x1], 1 }
 0x38b   :  { %1339 = vsyncpa [#allocation7], 1 }
 0x38c   :  { %1341 = vsyncpa [#allocation7 + $0x1], 1 }
 0x38d   :  { %1342 = vsyncpa [#allocation10], 1 }
 0x38e   :  { %1344 = vsyncpa [#allocation10 + $0x1], 1 }
 0x38f   :  { %1345 = vsyncpa [#allocation5], 1 }
 0x390   :  { %1347 = vsyncpa [#allocation5 + $0x1], 1 }

</bundles_post_ra>
